<compile_context>
chip_gen: v7x
topology: tpu7x:2x2x1
jax: 0.10.0
libtpu: 0.0.40
codegen_flags: <defaults>
</compile_context>

<pallas_src>
import functools

import jax
import jax.numpy as jnp
from jax import lax
from jax.experimental import pallas as pl
from jax.experimental.pallas import tpu as pltpu


def _round_up(x, m):
    return ((x + m - 1) // m) * m


def output_size(in_size, kernel_size, stride, padding):
    return int((in_size - kernel_size + 2 * padding) / stride) + 1


# ---------------------------------------------------------------------------
# Fused forward kernel: no grid, one launch, 4 operand slabs, all in VMEM.
# ---------------------------------------------------------------------------
def _convnet_kernel(x_ref, conv_ref, fcw_ref, fcv_ref, o_ref, *,
                    n_batch, seg, nsp, ksize, pad, cp, hdim, out_dim, l_dims):
    f32 = jnp.float32
    n_conv = len(l_dims) - 1
    l3 = l_dims[-1]

    # ---- constants built in-kernel (cheap VPU work; all other units idle) ----
    # Banded 0/1 tap-shift matrices: shifts[k][s, j] = 1 iff s == j + k - pad,
    # so (h @ shifts[k])[c, j] == h[c, j + k - pad]  (zero outside range).
    s_idx = lax.broadcasted_iota(jnp.int32, (nsp, nsp), 0)
    j_idx = lax.broadcasted_iota(jnp.int32, (nsp, nsp), 1)
    diff = s_idx - j_idx
    shifts = [(diff == (k - pad)).astype(f32) for k in range(ksize)]

    lane = lax.broadcasted_iota(jnp.int32, (1, nsp), 1)

    def lane_mask(l_len):
        # 1.0 on lanes inside some sample's valid window of length l_len.
        m = (lane >= pad) & (lane < pad + l_len)
        for i in range(1, n_batch):
            lo = i * seg + pad
            m = m | ((lane >= lo) & (lane < lo + l_len))
        return m.astype(f32)

    # ---- conv stack: activations are (cp, nsp), samples stacked along lanes ----
    h = x_ref[...]                                             # (cp, nsp)
    for li in range(n_conv):
        l_out = l_dims[li + 1]
        acc = jnp.zeros((cp, nsp), f32)
        for k in range(ksize):
            w_k = conv_ref[(li * ksize + k) * cp:(li * ksize + k + 1) * cp, :]
            shifted = jnp.dot(h, shifts[k], preferred_element_type=f32)
            acc = acc + jnp.dot(w_k, shifted, preferred_element_type=f32)
        b_row = conv_ref[(n_conv * ksize + li) * cp:
                         (n_conv * ksize + li + 1) * cp, 0:1]  # (cp, 1)
        # ReLU(conv + bias), then zero everything outside the valid windows so
        # the next layer's implicit zero-padding (and FC1 routing) stays exact.
        h = jnp.maximum(acc + b_row, 0.0) * lane_mask(l_out)

    # ---- flatten + Linear1 folded into a per-channel accumulation ----
    fcv = fcv_ref[...]                         # (5, hdim): b1, b2, gamma, beta, b3
    b1, b2 = fcv[0:1, :], fcv[1:2, :]
    gamma, beta, b3 = fcv[2:3, :], fcv[3:4, :], fcv[4:5, :]

    lane2 = lax.broadcasted_iota(jnp.int32, (n_batch, nsp), 1)
    row2 = lax.broadcasted_iota(jnp.int32, (n_batch, nsp), 0)
    start = row2 * seg + pad
    sel = ((lane2 >= start) & (lane2 < start + l3)).astype(f32)   # (n_batch, nsp)

    h1 = jnp.zeros((n_batch, hdim), f32)
    for c in range(cp):
        w1c = fcw_ref[c * nsp:(c + 1) * nsp, :]                   # (nsp, hdim)
        h1 = h1 + jnp.dot(sel * h[c:c + 1, :], w1c,
                          preferred_element_type=f32)
    h1 = jnp.maximum(h1 + b1, 0.0)                                # Linear1 + ReLU

    # ---- Linear2 -> BatchNorm1d (batch stats, eps=1e-5) -> ReLU -> Linear3 ----
    off = cp * nsp
    w2t = fcw_ref[off:off + hdim, :]
    h2 = jnp.dot(h1, w2t, preferred_element_type=f32) + b2

    mean = jnp.mean(h2, axis=0, keepdims=True)
    var = jnp.mean((h2 - mean) ** 2, axis=0, keepdims=True)
    h3 = jnp.maximum((h2 - mean) * lax.rsqrt(var + 1e-5) * gamma + beta, 0.0)

    w3t = fcw_ref[off + hdim:off + 2 * hdim, :]                   # (hdim, hdim), lanes padded
    logits = jnp.dot(h3, w3t, preferred_element_type=f32) + b3    # (n_batch, hdim)
    o_ref[...] = logits[:, :out_dim]                              # 2-D (N, out) store


# ---------------------------------------------------------------------------
# One-time parameter packing (run at init, NOT in the per-call jitted path).
# ---------------------------------------------------------------------------
def pack_params(params, *, n_batch, t_dim, filter_size=5, conv_padding=1):
    f32 = jnp.float32
    K, pad = filter_size, conv_padding
    cws = [params["cw1"], params["cw2"], params["cw3"]]
    cbs = [params["cb1"], params["cb2"], params["cb3"]]
    c_dims = [cws[0].shape[1]] + [w.shape[0] for w in cws]
    cp = _round_up(max(c_dims), 8)                 # uniform padded channel count
    l_dims = [t_dim]
    for _ in cws:
        l_dims.append(output_size(l_dims[-1], K, 1, pad))
    seg = t_dim + 2 * pad                          # per-sample lane segment (zero-guarded)
    nsp = _round_up(n_batch * seg, 8)              # lane width / W1-block sublane count

    # Conv slab: 3*K weight blocks (cp, cp) then 3 bias blocks (col 0 = bias).
    blocks = []
    for li, w in enumerate(cws):
        co, ci = c_dims[li + 1], c_dims[li]
        for k in range(K):
            blocks.append(jnp.zeros((cp, cp), f32).at[:co, :ci].set(
                w[:, :, k].astype(f32)))
    for li, b in enumerate(cbs):
        co = c_dims[li + 1]
        blocks.append(jnp.zeros((cp, cp), f32).at[:co, 0].set(b.astype(f32)))
    conv_slab = jnp.concatenate(blocks, axis=0)                  # ((3K+3)*cp, cp)

    # FC weight slab: routed W1 blocks (cp*nsp, H) + W2^T (H, H) + padded W3^T (H, H).
    hdim = params["w1"].shape[0]
    out_dim = params["w3"].shape[0]
    c3, l3 = c_dims[3], l_dims[3]
    w1_cts = params["w1"].astype(f32).T.reshape(c3, l3, hdim)    # [c, t, j] = W1[j, c*L3+t]
    w1_blocks = jnp.zeros((cp, nsp, hdim), f32)
    for i in range(n_batch):                                     # replicate per sample window
        lo = i * seg + pad
        w1_blocks = w1_blocks.at[:c3, lo:lo + l3, :].set(w1_cts)
    w2t = params["w2"].astype(f32).T
    w3t = jnp.zeros((hdim, hdim), f32).at[:, :out_dim].set(params["w3"].astype(f32).T)
    fcw_slab = jnp.concatenate([w1_blocks.reshape(cp * nsp, hdim), w2t, w3t], axis=0)

    # FC vector slab: b1, b2, gamma, beta, b3 (padded to hdim lanes).
    b3p = jnp.zeros((hdim,), f32).at[:out_dim].set(params["b3"].astype(f32))
    fcv_slab = jnp.concatenate(
        [jnp.stack([params["b1"], params["b2"],
                    params["bn_gamma"], params["bn_beta"]]).astype(f32),
         b3p[None, :]], axis=0)                                  # (5, hdim)

    packed = dict(conv=conv_slab, fcw=fcw_slab, fcv=fcv_slab)
    config = dict(n_batch=n_batch, seg=seg, nsp=nsp, ksize=K, pad=pad, cp=cp,
                  hdim=hdim, out_dim=out_dim, l_dims=tuple(l_dims), c0=c_dims[0])
    return packed, config


def build_forward(config):
    n_batch, seg, nsp = config["n_batch"], config["seg"], config["nsp"]
    cp, c0, pad = config["cp"], config["c0"], config["pad"]
    out_dim, l0 = config["out_dim"], config["l_dims"][0]

    kernel = functools.partial(
        _convnet_kernel, n_batch=n_batch, seg=seg, nsp=nsp, ksize=config["ksize"],
        pad=pad, cp=cp, hdim=config["hdim"], out_dim=out_dim,
        l_dims=config["l_dims"])

    vmem = pl.BlockSpec(memory_space=pltpu.MemorySpace.VMEM)
    call = pl.pallas_call(
        kernel,
        out_shape=jax.ShapeDtypeStruct((n_batch, out_dim), jnp.float32),
        in_specs=[vmem] * 4,
        out_specs=vmem,
    )

    @jax.jit
    def forward(x, packed):
        # Only per-call prep: lay x out as (cp, nsp) -- channels on sublanes,
        # samples stacked along lanes in fixed zero-guarded segments.
        xt = jnp.transpose(x, (1, 0, 2)).astype(jnp.float32)            # (C0, N, L0)
        xt = jnp.pad(xt, ((0, cp - c0), (0, 0), (pad, seg - l0 - pad)))  # (cp, N, seg)
        xl = jnp.pad(xt.reshape(cp, n_batch * seg),
                     ((0, 0), (0, nsp - n_batch * seg)))                 # (cp, nsp)
        return call(xl, packed["conv"], packed["fcw"], packed["fcv"])

    return forward


# ---------------------------------------------------------------------------
# Pure-JAX reference (silent correctness check) and parameter init.
# ---------------------------------------------------------------------------
def convnet_forward_ref(x, params):
    def conv(h, w, b):
        out = lax.conv_general_dilated(
            h, w, window_strides=(1,), padding=[(1, 1)],
            dimension_numbers=("NCH", "OIH", "NCH"))
        return jnp.maximum(out + b[None, :, None], 0.0)

    h = conv(x, params["cw1"], params["cb1"])
    h = conv(h, params["cw2"], params["cb2"])
    h = conv(h, params["cw3"], params["cb3"])
    hf = h.reshape(h.shape[0], -1)
    h1 = jnp.maximum(hf @ params["w1"].T + params["b1"], 0.0)
    h2 = h1 @ params["w2"].T + params["b2"]
    mean = jnp.mean(h2, axis=0, keepdims=True)
    var = jnp.mean((h2 - mean) ** 2, axis=0, keepdims=True)
    h2n = (h2 - mean) * lax.rsqrt(var + 1e-5) * params["bn_gamma"] + params["bn_beta"]
    h3 = jnp.maximum(h2n, 0.0)
    return h3 @ params["w3"].T + params["b3"]


def init_params(key, ch_dim, t_dim, h_dim, out_dim, filter_size=5):
    ks = jax.random.split(key, 12)

    def u(k, shape, scale=0.1):
        return (jax.random.uniform(k, shape, jnp.float32) - 0.5) * 2 * scale

    l1 = output_size(t_dim, filter_size, 1, 1)
    l2 = output_size(l1, filter_size, 1, 1)
    l3 = output_size(l2, filter_size, 1, 1)
    fc_in = ch_dim[3] * l3

    return {
        "cw1": u(ks[0], (ch_dim[1], ch_dim[0], filter_size)),
        "cb1": u(ks[1], (ch_dim[1],)),
        "cw2": u(ks[2], (ch_dim[2], ch_dim[1], filter_size)),
        "cb2": u(ks[3], (ch_dim[2],)),
        "cw3": u(ks[4], (ch_dim[3], ch_dim[2], filter_size)),
        "cb3": u(ks[5], (ch_dim[3],)),
        "w1": u(ks[6], (h_dim, fc_in)),
        "b1": u(ks[7], (h_dim,)),
        "w2": u(ks[8], (h_dim, h_dim)),
        "b2": u(ks[9], (h_dim,)),
        "bn_gamma": jnp.ones((h_dim,), jnp.float32),
        "bn_beta": jnp.zeros((h_dim,), jnp.float32),
        "w3": u(ks[10], (out_dim, h_dim)),
        "b3": u(ks[11], (out_dim,)),
    }


if __name__ == "__main__":
    # args: t_dim=16, x_dim=1, h_dim=32, ch_dim=[4, 8, 8, 8], output_size=1
    N, T = 2, 16
    ch_dim = [4, 8, 8, 8]
    h_dim, out_dim = 32, 1

    key = jax.random.PRNGKey(0)
    k_x, k_p = jax.random.split(key)
    x = jax.random.normal(k_x, (N, ch_dim[0], T), jnp.float32)   # NCL, like PyTorch
    params = init_params(k_p, ch_dim, T, h_dim, out_dim)

    # Pack parameters ONCE at init (hoisted out of the per-call jitted path).
    packed, config = pack_params(params, n_batch=N, t_dim=T)
    forward = build_forward(config)

    pred = forward(x, packed)
    jax.block_until_ready(pred)
    assert pred.shape == (N, out_dim)

    ref = convnet_forward_ref(x, params)
    assert jnp.allclose(pred, ref, atol=2e-4, rtol=2e-4), "mismatch vs. JAX reference"

    print("KERNEL_OK")
</pallas_src>

<mosaic_0001>
module attributes {stable_mosaic.version = 11 : i64} {
  func.func @_convnet_kernel(%arg0: memref<8x40xf32, #tpu.memory_space<vmem>>, %arg1: memref<144x8xf32, #tpu.memory_space<vmem>>, %arg2: memref<384x32xf32, #tpu.memory_space<vmem>>, %arg3: memref<5x32xf32, #tpu.memory_space<vmem>>, %arg4: memref<2x1xf32, #tpu.memory_space<vmem>>) attributes {dimension_semantics = [], scalar_prefetch = 0 : i64, scratch_operands = 0 : i64, tpu.core_type = #tpu.core_type<tc>} {
    %0 = tpu.iota {dimensions = array<i32: 0>} : vector<40x40xi32>
    %1 = tpu.iota {dimensions = array<i32: 1>} : vector<40x40xi32>
    %2 = arith.subi %0, %1 : vector<40x40xi32>
    %c-1_i32 = arith.constant -1 : i32
    %3 = vector.broadcast %c-1_i32 : i32 to vector<40x40xi32>
    %4 = arith.cmpi eq, %2, %3 : vector<40x40xi32>
    %5 = arith.extui %4 : vector<40x40xi1> to vector<40x40xi32>
    %6 = arith.sitofp %5 : vector<40x40xi32> to vector<40x40xf32>
    %c0_i32 = arith.constant 0 : i32
    %7 = vector.broadcast %c0_i32 : i32 to vector<40x40xi32>
    %8 = arith.cmpi eq, %2, %7 : vector<40x40xi32>
    %9 = arith.extui %8 : vector<40x40xi1> to vector<40x40xi32>
    %10 = arith.sitofp %9 : vector<40x40xi32> to vector<40x40xf32>
    %c1_i32 = arith.constant 1 : i32
    %11 = vector.broadcast %c1_i32 : i32 to vector<40x40xi32>
    %12 = arith.cmpi eq, %2, %11 : vector<40x40xi32>
    %13 = arith.extui %12 : vector<40x40xi1> to vector<40x40xi32>
    %14 = arith.sitofp %13 : vector<40x40xi32> to vector<40x40xf32>
    %c2_i32 = arith.constant 2 : i32
    %15 = vector.broadcast %c2_i32 : i32 to vector<40x40xi32>
    %16 = arith.cmpi eq, %2, %15 : vector<40x40xi32>
    %17 = arith.extui %16 : vector<40x40xi1> to vector<40x40xi32>
    %18 = arith.sitofp %17 : vector<40x40xi32> to vector<40x40xf32>
    %c3_i32 = arith.constant 3 : i32
    %19 = vector.broadcast %c3_i32 : i32 to vector<40x40xi32>
    %20 = arith.cmpi eq, %2, %19 : vector<40x40xi32>
    %21 = arith.extui %20 : vector<40x40xi1> to vector<40x40xi32>
    %22 = arith.sitofp %21 : vector<40x40xi32> to vector<40x40xf32>
    %23 = tpu.iota {dimensions = array<i32: 1>} : vector<1x40xi32>
    %c0 = arith.constant 0 : index
    %c0_0 = arith.constant 0 : index
    %24 = vector.load %arg0[%c0, %c0_0] : memref<8x40xf32, #tpu.memory_space<vmem>>, vector<8x40xf32>
    %cst = arith.constant 0.000000e+00 : f32
    %25 = vector.broadcast %cst : f32 to vector<8x40xf32>
    %c0_1 = arith.constant 0 : index
    %c0_2 = arith.constant 0 : index
    %26 = vector.load %arg1[%c0_1, %c0_2] : memref<144x8xf32, #tpu.memory_space<vmem>>, vector<8x8xf32>
    %cst_3 = arith.constant dense<0.000000e+00> : vector<8x40xf32>
    %27 = tpu.matmul %24, %6, %cst_3 {dimension_numbers = #tpu.dot_dimension_numbers<[1], [0], [0], [1], [0, 0, 1, 1], [], []>} : vector<8x40xf32>, vector<40x40xf32>, vector<8x40xf32> -> vector<8x40xf32>
    %cst_4 = arith.constant dense<0.000000e+00> : vector<8x40xf32>
    %28 = tpu.matmul %26, %27, %cst_4 {dimension_numbers = #tpu.dot_dimension_numbers<[1], [0], [0], [1], [0, 0, 1, 1], [], []>} : vector<8x8xf32>, vector<8x40xf32>, vector<8x40xf32> -> vector<8x40xf32>
    %29 = arith.addf %25, %28 : vector<8x40xf32>
    %c8 = arith.constant 8 : index
    %c0_5 = arith.constant 0 : index
    %30 = vector.load %arg1[%c8, %c0_5] : memref<144x8xf32, #tpu.memory_space<vmem>>, vector<8x8xf32>
    %cst_6 = arith.constant dense<0.000000e+00> : vector<8x40xf32>
    %31 = tpu.matmul %24, %10, %cst_6 {dimension_numbers = #tpu.dot_dimension_numbers<[1], [0], [0], [1], [0, 0, 1, 1], [], []>} : vector<8x40xf32>, vector<40x40xf32>, vector<8x40xf32> -> vector<8x40xf32>
    %cst_7 = arith.constant dense<0.000000e+00> : vector<8x40xf32>
    %32 = tpu.matmul %30, %31, %cst_7 {dimension_numbers = #tpu.dot_dimension_numbers<[1], [0], [0], [1], [0, 0, 1, 1], [], []>} : vector<8x8xf32>, vector<8x40xf32>, vector<8x40xf32> -> vector<8x40xf32>
    %33 = arith.addf %29, %32 : vector<8x40xf32>
    %c16 = arith.constant 16 : index
    %c0_8 = arith.constant 0 : index
    %34 = vector.load %arg1[%c16, %c0_8] : memref<144x8xf32, #tpu.memory_space<vmem>>, vector<8x8xf32>
    %cst_9 = arith.constant dense<0.000000e+00> : vector<8x40xf32>
    %35 = tpu.matmul %24, %14, %cst_9 {dimension_numbers = #tpu.dot_dimension_numbers<[1], [0], [0], [1], [0, 0, 1, 1], [], []>} : vector<8x40xf32>, vector<40x40xf32>, vector<8x40xf32> -> vector<8x40xf32>
    %cst_10 = arith.constant dense<0.000000e+00> : vector<8x40xf32>
    %36 = tpu.matmul %34, %35, %cst_10 {dimension_numbers = #tpu.dot_dimension_numbers<[1], [0], [0], [1], [0, 0, 1, 1], [], []>} : vector<8x8xf32>, vector<8x40xf32>, vector<8x40xf32> -> vector<8x40xf32>
    %37 = arith.addf %33, %36 : vector<8x40xf32>
    %c24 = arith.constant 24 : index
    %c0_11 = arith.constant 0 : index
    %38 = vector.load %arg1[%c24, %c0_11] : memref<144x8xf32, #tpu.memory_space<vmem>>, vector<8x8xf32>
    %cst_12 = arith.constant dense<0.000000e+00> : vector<8x40xf32>
    %39 = tpu.matmul %24, %18, %cst_12 {dimension_numbers = #tpu.dot_dimension_numbers<[1], [0], [0], [1], [0, 0, 1, 1], [], []>} : vector<8x40xf32>, vector<40x40xf32>, vector<8x40xf32> -> vector<8x40xf32>
    %cst_13 = arith.constant dense<0.000000e+00> : vector<8x40xf32>
    %40 = tpu.matmul %38, %39, %cst_13 {dimension_numbers = #tpu.dot_dimension_numbers<[1], [0], [0], [1], [0, 0, 1, 1], [], []>} : vector<8x8xf32>, vector<8x40xf32>, vector<8x40xf32> -> vector<8x40xf32>
    %41 = arith.addf %37, %40 : vector<8x40xf32>
    %c32 = arith.constant 32 : index
    %c0_14 = arith.constant 0 : index
    %42 = vector.load %arg1[%c32, %c0_14] : memref<144x8xf32, #tpu.memory_space<vmem>>, vector<8x8xf32>
    %cst_15 = arith.constant dense<0.000000e+00> : vector<8x40xf32>
    %43 = tpu.matmul %24, %22, %cst_15 {dimension_numbers = #tpu.dot_dimension_numbers<[1], [0], [0], [1], [0, 0, 1, 1], [], []>} : vector<8x40xf32>, vector<40x40xf32>, vector<8x40xf32> -> vector<8x40xf32>
    %cst_16 = arith.constant dense<0.000000e+00> : vector<8x40xf32>
    %44 = tpu.matmul %42, %43, %cst_16 {dimension_numbers = #tpu.dot_dimension_numbers<[1], [0], [0], [1], [0, 0, 1, 1], [], []>} : vector<8x8xf32>, vector<8x40xf32>, vector<8x40xf32> -> vector<8x40xf32>
    %45 = arith.addf %41, %44 : vector<8x40xf32>
    %c120 = arith.constant 120 : index
    %c0_17 = arith.constant 0 : index
    %46 = vector.load %arg1[%c120, %c0_17] : memref<144x8xf32, #tpu.memory_space<vmem>>, vector<8x1xf32>
    %47 = vector.broadcast %46 : vector<8x1xf32> to vector<8x40xf32>
    %48 = arith.addf %45, %47 : vector<8x40xf32>
    %cst_18 = arith.constant 0.000000e+00 : f32
    %49 = vector.broadcast %cst_18 : f32 to vector<8x40xf32>
    %50 = arith.maximumf %48, %49 : vector<8x40xf32>
    %c1_i32_19 = arith.constant 1 : i32
    %51 = vector.broadcast %c1_i32_19 : i32 to vector<1x40xi32>
    %52 = arith.cmpi sge, %23, %51 : vector<1x40xi32>
    %c15_i32 = arith.constant 15 : i32
    %53 = vector.broadcast %c15_i32 : i32 to vector<1x40xi32>
    %54 = arith.cmpi slt, %23, %53 : vector<1x40xi32>
    %55 = arith.andi %52, %54 : vector<1x40xi1>
    %c19_i32 = arith.constant 19 : i32
    %56 = vector.broadcast %c19_i32 : i32 to vector<1x40xi32>
    %57 = arith.cmpi sge, %23, %56 : vector<1x40xi32>
    %c33_i32 = arith.constant 33 : i32
    %58 = vector.broadcast %c33_i32 : i32 to vector<1x40xi32>
    %59 = arith.cmpi slt, %23, %58 : vector<1x40xi32>
    %60 = arith.andi %57, %59 : vector<1x40xi1>
    %61 = arith.ori %55, %60 : vector<1x40xi1>
    %62 = arith.extui %61 : vector<1x40xi1> to vector<1x40xi32>
    %63 = arith.sitofp %62 : vector<1x40xi32> to vector<1x40xf32>
    %64 = vector.broadcast %63 : vector<1x40xf32> to vector<8x40xf32>
    %65 = arith.mulf %50, %64 : vector<8x40xf32>
    %cst_20 = arith.constant 0.000000e+00 : f32
    %66 = vector.broadcast %cst_20 : f32 to vector<8x40xf32>
    %c40 = arith.constant 40 : index
    %c0_21 = arith.constant 0 : index
    %67 = vector.load %arg1[%c40, %c0_21] : memref<144x8xf32, #tpu.memory_space<vmem>>, vector<8x8xf32>
    %cst_22 = arith.constant dense<0.000000e+00> : vector<8x40xf32>
    %68 = tpu.matmul %65, %6, %cst_22 {dimension_numbers = #tpu.dot_dimension_numbers<[1], [0], [0], [1], [0, 0, 1, 1], [], []>} : vector<8x40xf32>, vector<40x40xf32>, vector<8x40xf32> -> vector<8x40xf32>
    %cst_23 = arith.constant dense<0.000000e+00> : vector<8x40xf32>
    %69 = tpu.matmul %67, %68, %cst_23 {dimension_numbers = #tpu.dot_dimension_numbers<[1], [0], [0], [1], [0, 0, 1, 1], [], []>} : vector<8x8xf32>, vector<8x40xf32>, vector<8x40xf32> -> vector<8x40xf32>
    %70 = arith.addf %66, %69 : vector<8x40xf32>
    %c48 = arith.constant 48 : index
    %c0_24 = arith.constant 0 : index
    %71 = vector.load %arg1[%c48, %c0_24] : memref<144x8xf32, #tpu.memory_space<vmem>>, vector<8x8xf32>
    %cst_25 = arith.constant dense<0.000000e+00> : vector<8x40xf32>
    %72 = tpu.matmul %65, %10, %cst_25 {dimension_numbers = #tpu.dot_dimension_numbers<[1], [0], [0], [1], [0, 0, 1, 1], [], []>} : vector<8x40xf32>, vector<40x40xf32>, vector<8x40xf32> -> vector<8x40xf32>
    %cst_26 = arith.constant dense<0.000000e+00> : vector<8x40xf32>
    %73 = tpu.matmul %71, %72, %cst_26 {dimension_numbers = #tpu.dot_dimension_numbers<[1], [0], [0], [1], [0, 0, 1, 1], [], []>} : vector<8x8xf32>, vector<8x40xf32>, vector<8x40xf32> -> vector<8x40xf32>
    %74 = arith.addf %70, %73 : vector<8x40xf32>
    %c56 = arith.constant 56 : index
    %c0_27 = arith.constant 0 : index
    %75 = vector.load %arg1[%c56, %c0_27] : memref<144x8xf32, #tpu.memory_space<vmem>>, vector<8x8xf32>
    %cst_28 = arith.constant dense<0.000000e+00> : vector<8x40xf32>
    %76 = tpu.matmul %65, %14, %cst_28 {dimension_numbers = #tpu.dot_dimension_numbers<[1], [0], [0], [1], [0, 0, 1, 1], [], []>} : vector<8x40xf32>, vector<40x40xf32>, vector<8x40xf32> -> vector<8x40xf32>
    %cst_29 = arith.constant dense<0.000000e+00> : vector<8x40xf32>
    %77 = tpu.matmul %75, %76, %cst_29 {dimension_numbers = #tpu.dot_dimension_numbers<[1], [0], [0], [1], [0, 0, 1, 1], [], []>} : vector<8x8xf32>, vector<8x40xf32>, vector<8x40xf32> -> vector<8x40xf32>
    %78 = arith.addf %74, %77 : vector<8x40xf32>
    %c64 = arith.constant 64 : index
    %c0_30 = arith.constant 0 : index
    %79 = vector.load %arg1[%c64, %c0_30] : memref<144x8xf32, #tpu.memory_space<vmem>>, vector<8x8xf32>
    %cst_31 = arith.constant dense<0.000000e+00> : vector<8x40xf32>
    %80 = tpu.matmul %65, %18, %cst_31 {dimension_numbers = #tpu.dot_dimension_numbers<[1], [0], [0], [1], [0, 0, 1, 1], [], []>} : vector<8x40xf32>, vector<40x40xf32>, vector<8x40xf32> -> vector<8x40xf32>
    %cst_32 = arith.constant dense<0.000000e+00> : vector<8x40xf32>
    %81 = tpu.matmul %79, %80, %cst_32 {dimension_numbers = #tpu.dot_dimension_numbers<[1], [0], [0], [1], [0, 0, 1, 1], [], []>} : vector<8x8xf32>, vector<8x40xf32>, vector<8x40xf32> -> vector<8x40xf32>
    %82 = arith.addf %78, %81 : vector<8x40xf32>
    %c72 = arith.constant 72 : index
    %c0_33 = arith.constant 0 : index
    %83 = vector.load %arg1[%c72, %c0_33] : memref<144x8xf32, #tpu.memory_space<vmem>>, vector<8x8xf32>
    %cst_34 = arith.constant dense<0.000000e+00> : vector<8x40xf32>
    %84 = tpu.matmul %65, %22, %cst_34 {dimension_numbers = #tpu.dot_dimension_numbers<[1], [0], [0], [1], [0, 0, 1, 1], [], []>} : vector<8x40xf32>, vector<40x40xf32>, vector<8x40xf32> -> vector<8x40xf32>
    %cst_35 = arith.constant dense<0.000000e+00> : vector<8x40xf32>
    %85 = tpu.matmul %83, %84, %cst_35 {dimension_numbers = #tpu.dot_dimension_numbers<[1], [0], [0], [1], [0, 0, 1, 1], [], []>} : vector<8x8xf32>, vector<8x40xf32>, vector<8x40xf32> -> vector<8x40xf32>
    %86 = arith.addf %82, %85 : vector<8x40xf32>
    %c128 = arith.constant 128 : index
    %c0_36 = arith.constant 0 : index
    %87 = vector.load %arg1[%c128, %c0_36] : memref<144x8xf32, #tpu.memory_space<vmem>>, vector<8x1xf32>
    %88 = vector.broadcast %87 : vector<8x1xf32> to vector<8x40xf32>
    %89 = arith.addf %86, %88 : vector<8x40xf32>
    %cst_37 = arith.constant 0.000000e+00 : f32
    %90 = vector.broadcast %cst_37 : f32 to vector<8x40xf32>
    %91 = arith.maximumf %89, %90 : vector<8x40xf32>
    %c1_i32_38 = arith.constant 1 : i32
    %92 = vector.broadcast %c1_i32_38 : i32 to vector<1x40xi32>
    %93 = arith.cmpi sge, %23, %92 : vector<1x40xi32>
    %c13_i32 = arith.constant 13 : i32
    %94 = vector.broadcast %c13_i32 : i32 to vector<1x40xi32>
    %95 = arith.cmpi slt, %23, %94 : vector<1x40xi32>
    %96 = arith.andi %93, %95 : vector<1x40xi1>
    %c19_i32_39 = arith.constant 19 : i32
    %97 = vector.broadcast %c19_i32_39 : i32 to vector<1x40xi32>
    %98 = arith.cmpi sge, %23, %97 : vector<1x40xi32>
    %c31_i32 = arith.constant 31 : i32
    %99 = vector.broadcast %c31_i32 : i32 to vector<1x40xi32>
    %100 = arith.cmpi slt, %23, %99 : vector<1x40xi32>
    %101 = arith.andi %98, %100 : vector<1x40xi1>
    %102 = arith.ori %96, %101 : vector<1x40xi1>
    %103 = arith.extui %102 : vector<1x40xi1> to vector<1x40xi32>
    %104 = arith.sitofp %103 : vector<1x40xi32> to vector<1x40xf32>
    %105 = vector.broadcast %104 : vector<1x40xf32> to vector<8x40xf32>
    %106 = arith.mulf %91, %105 : vector<8x40xf32>
    %cst_40 = arith.constant 0.000000e+00 : f32
    %107 = vector.broadcast %cst_40 : f32 to vector<8x40xf32>
    %c80 = arith.constant 80 : index
    %c0_41 = arith.constant 0 : index
    %108 = vector.load %arg1[%c80, %c0_41] : memref<144x8xf32, #tpu.memory_space<vmem>>, vector<8x8xf32>
    %cst_42 = arith.constant dense<0.000000e+00> : vector<8x40xf32>
    %109 = tpu.matmul %106, %6, %cst_42 {dimension_numbers = #tpu.dot_dimension_numbers<[1], [0], [0], [1], [0, 0, 1, 1], [], []>} : vector<8x40xf32>, vector<40x40xf32>, vector<8x40xf32> -> vector<8x40xf32>
    %cst_43 = arith.constant dense<0.000000e+00> : vector<8x40xf32>
    %110 = tpu.matmul %108, %109, %cst_43 {dimension_numbers = #tpu.dot_dimension_numbers<[1], [0], [0], [1], [0, 0, 1, 1], [], []>} : vector<8x8xf32>, vector<8x40xf32>, vector<8x40xf32> -> vector<8x40xf32>
    %111 = arith.addf %107, %110 : vector<8x40xf32>
    %c88 = arith.constant 88 : index
    %c0_44 = arith.constant 0 : index
    %112 = vector.load %arg1[%c88, %c0_44] : memref<144x8xf32, #tpu.memory_space<vmem>>, vector<8x8xf32>
    %cst_45 = arith.constant dense<0.000000e+00> : vector<8x40xf32>
    %113 = tpu.matmul %106, %10, %cst_45 {dimension_numbers = #tpu.dot_dimension_numbers<[1], [0], [0], [1], [0, 0, 1, 1], [], []>} : vector<8x40xf32>, vector<40x40xf32>, vector<8x40xf32> -> vector<8x40xf32>
    %cst_46 = arith.constant dense<0.000000e+00> : vector<8x40xf32>
    %114 = tpu.matmul %112, %113, %cst_46 {dimension_numbers = #tpu.dot_dimension_numbers<[1], [0], [0], [1], [0, 0, 1, 1], [], []>} : vector<8x8xf32>, vector<8x40xf32>, vector<8x40xf32> -> vector<8x40xf32>
    %115 = arith.addf %111, %114 : vector<8x40xf32>
    %c96 = arith.constant 96 : index
    %c0_47 = arith.constant 0 : index
    %116 = vector.load %arg1[%c96, %c0_47] : memref<144x8xf32, #tpu.memory_space<vmem>>, vector<8x8xf32>
    %cst_48 = arith.constant dense<0.000000e+00> : vector<8x40xf32>
    %117 = tpu.matmul %106, %14, %cst_48 {dimension_numbers = #tpu.dot_dimension_numbers<[1], [0], [0], [1], [0, 0, 1, 1], [], []>} : vector<8x40xf32>, vector<40x40xf32>, vector<8x40xf32> -> vector<8x40xf32>
    %cst_49 = arith.constant dense<0.000000e+00> : vector<8x40xf32>
    %118 = tpu.matmul %116, %117, %cst_49 {dimension_numbers = #tpu.dot_dimension_numbers<[1], [0], [0], [1], [0, 0, 1, 1], [], []>} : vector<8x8xf32>, vector<8x40xf32>, vector<8x40xf32> -> vector<8x40xf32>
    %119 = arith.addf %115, %118 : vector<8x40xf32>
    %c104 = arith.constant 104 : index
    %c0_50 = arith.constant 0 : index
    %120 = vector.load %arg1[%c104, %c0_50] : memref<144x8xf32, #tpu.memory_space<vmem>>, vector<8x8xf32>
    %cst_51 = arith.constant dense<0.000000e+00> : vector<8x40xf32>
    %121 = tpu.matmul %106, %18, %cst_51 {dimension_numbers = #tpu.dot_dimension_numbers<[1], [0], [0], [1], [0, 0, 1, 1], [], []>} : vector<8x40xf32>, vector<40x40xf32>, vector<8x40xf32> -> vector<8x40xf32>
    %cst_52 = arith.constant dense<0.000000e+00> : vector<8x40xf32>
    %122 = tpu.matmul %120, %121, %cst_52 {dimension_numbers = #tpu.dot_dimension_numbers<[1], [0], [0], [1], [0, 0, 1, 1], [], []>} : vector<8x8xf32>, vector<8x40xf32>, vector<8x40xf32> -> vector<8x40xf32>
    %123 = arith.addf %119, %122 : vector<8x40xf32>
    %c112 = arith.constant 112 : index
    %c0_53 = arith.constant 0 : index
    %124 = vector.load %arg1[%c112, %c0_53] : memref<144x8xf32, #tpu.memory_space<vmem>>, vector<8x8xf32>
    %cst_54 = arith.constant dense<0.000000e+00> : vector<8x40xf32>
    %125 = tpu.matmul %106, %22, %cst_54 {dimension_numbers = #tpu.dot_dimension_numbers<[1], [0], [0], [1], [0, 0, 1, 1], [], []>} : vector<8x40xf32>, vector<40x40xf32>, vector<8x40xf32> -> vector<8x40xf32>
    %cst_55 = arith.constant dense<0.000000e+00> : vector<8x40xf32>
    %126 = tpu.matmul %124, %125, %cst_55 {dimension_numbers = #tpu.dot_dimension_numbers<[1], [0], [0], [1], [0, 0, 1, 1], [], []>} : vector<8x8xf32>, vector<8x40xf32>, vector<8x40xf32> -> vector<8x40xf32>
    %127 = arith.addf %123, %126 : vector<8x40xf32>
    %c136 = arith.constant 136 : index
    %c0_56 = arith.constant 0 : index
    %128 = vector.load %arg1[%c136, %c0_56] : memref<144x8xf32, #tpu.memory_space<vmem>>, vector<8x1xf32>
    %129 = vector.broadcast %128 : vector<8x1xf32> to vector<8x40xf32>
    %130 = arith.addf %127, %129 : vector<8x40xf32>
    %cst_57 = arith.constant 0.000000e+00 : f32
    %131 = vector.broadcast %cst_57 : f32 to vector<8x40xf32>
    %132 = arith.maximumf %130, %131 : vector<8x40xf32>
    %c1_i32_58 = arith.constant 1 : i32
    %133 = vector.broadcast %c1_i32_58 : i32 to vector<1x40xi32>
    %134 = arith.cmpi sge, %23, %133 : vector<1x40xi32>
    %c11_i32 = arith.constant 11 : i32
    %135 = vector.broadcast %c11_i32 : i32 to vector<1x40xi32>
    %136 = arith.cmpi slt, %23, %135 : vector<1x40xi32>
    %137 = arith.andi %134, %136 : vector<1x40xi1>
    %c19_i32_59 = arith.constant 19 : i32
    %138 = vector.broadcast %c19_i32_59 : i32 to vector<1x40xi32>
    %139 = arith.cmpi sge, %23, %138 : vector<1x40xi32>
    %c29_i32 = arith.constant 29 : i32
    %140 = vector.broadcast %c29_i32 : i32 to vector<1x40xi32>
    %141 = arith.cmpi slt, %23, %140 : vector<1x40xi32>
    %142 = arith.andi %139, %141 : vector<1x40xi1>
    %143 = arith.ori %137, %142 : vector<1x40xi1>
    %144 = arith.extui %143 : vector<1x40xi1> to vector<1x40xi32>
    %145 = arith.sitofp %144 : vector<1x40xi32> to vector<1x40xf32>
    %146 = vector.broadcast %145 : vector<1x40xf32> to vector<8x40xf32>
    %147 = arith.mulf %132, %146 : vector<8x40xf32>
    %c0_60 = arith.constant 0 : index
    %c0_61 = arith.constant 0 : index
    %148 = vector.load %arg3[%c0_60, %c0_61] : memref<5x32xf32, #tpu.memory_space<vmem>>, vector<5x32xf32>
    %149 = vector.extract_strided_slice %148 {offsets = [0, 0], sizes = [1, 32], strides = [1, 1]} : vector<5x32xf32> to vector<1x32xf32>
    %150 = vector.extract_strided_slice %148 {offsets = [1, 0], sizes = [1, 32], strides = [1, 1]} : vector<5x32xf32> to vector<1x32xf32>
    %151 = vector.extract_strided_slice %148 {offsets = [2, 0], sizes = [1, 32], strides = [1, 1]} : vector<5x32xf32> to vector<1x32xf32>
    %152 = vector.extract_strided_slice %148 {offsets = [3, 0], sizes = [1, 32], strides = [1, 1]} : vector<5x32xf32> to vector<1x32xf32>
    %153 = vector.extract_strided_slice %148 {offsets = [4, 0], sizes = [1, 32], strides = [1, 1]} : vector<5x32xf32> to vector<1x32xf32>
    %154 = tpu.iota {dimensions = array<i32: 1>} : vector<2x40xi32>
    %155 = tpu.iota {dimensions = array<i32: 0>} : vector<2x40xi32>
    %c18_i32 = arith.constant 18 : i32
    %156 = vector.broadcast %c18_i32 : i32 to vector<2x40xi32>
    %157 = arith.muli %155, %156 : vector<2x40xi32>
    %c1_i32_62 = arith.constant 1 : i32
    %158 = vector.broadcast %c1_i32_62 : i32 to vector<2x40xi32>
    %159 = arith.addi %157, %158 : vector<2x40xi32>
    %160 = arith.cmpi sge, %154, %159 : vector<2x40xi32>
    %c10_i32 = arith.constant 10 : i32
    %161 = vector.broadcast %c10_i32 : i32 to vector<2x40xi32>
    %162 = arith.addi %159, %161 : vector<2x40xi32>
    %163 = arith.cmpi slt, %154, %162 : vector<2x40xi32>
    %164 = arith.andi %160, %163 : vector<2x40xi1>
    %165 = arith.extui %164 : vector<2x40xi1> to vector<2x40xi32>
    %166 = arith.sitofp %165 : vector<2x40xi32> to vector<2x40xf32>
    %cst_63 = arith.constant 0.000000e+00 : f32
    %167 = vector.broadcast %cst_63 : f32 to vector<2x32xf32>
    %c0_64 = arith.constant 0 : index
    %c0_65 = arith.constant 0 : index
    %168 = vector.load %arg2[%c0_64, %c0_65] : memref<384x32xf32, #tpu.memory_space<vmem>>, vector<40x32xf32>
    %169 = vector.extract_strided_slice %147 {offsets = [0, 0], sizes = [1, 40], strides = [1, 1]} : vector<8x40xf32> to vector<1x40xf32>
    %170 = vector.broadcast %169 : vector<1x40xf32> to vector<2x40xf32>
    %171 = arith.mulf %166, %170 : vector<2x40xf32>
    %cst_66 = arith.constant dense<0.000000e+00> : vector<2x32xf32>
    %172 = tpu.matmul %171, %168, %cst_66 {dimension_numbers = #tpu.dot_dimension_numbers<[1], [0], [0], [1], [0, 0, 1, 1], [], []>} : vector<2x40xf32>, vector<40x32xf32>, vector<2x32xf32> -> vector<2x32xf32>
    %173 = arith.addf %167, %172 : vector<2x32xf32>
    %c40_67 = arith.constant 40 : index
    %c0_68 = arith.constant 0 : index
    %174 = vector.load %arg2[%c40_67, %c0_68] : memref<384x32xf32, #tpu.memory_space<vmem>>, vector<40x32xf32>
    %175 = vector.extract_strided_slice %147 {offsets = [1, 0], sizes = [1, 40], strides = [1, 1]} : vector<8x40xf32> to vector<1x40xf32>
    %176 = vector.broadcast %175 : vector<1x40xf32> to vector<2x40xf32>
    %177 = arith.mulf %166, %176 : vector<2x40xf32>
    %cst_69 = arith.constant dense<0.000000e+00> : vector<2x32xf32>
    %178 = tpu.matmul %177, %174, %cst_69 {dimension_numbers = #tpu.dot_dimension_numbers<[1], [0], [0], [1], [0, 0, 1, 1], [], []>} : vector<2x40xf32>, vector<40x32xf32>, vector<2x32xf32> -> vector<2x32xf32>
    %179 = arith.addf %173, %178 : vector<2x32xf32>
    %c80_70 = arith.constant 80 : index
    %c0_71 = arith.constant 0 : index
    %180 = vector.load %arg2[%c80_70, %c0_71] : memref<384x32xf32, #tpu.memory_space<vmem>>, vector<40x32xf32>
    %181 = vector.extract_strided_slice %147 {offsets = [2, 0], sizes = [1, 40], strides = [1, 1]} : vector<8x40xf32> to vector<1x40xf32>
    %182 = vector.broadcast %181 : vector<1x40xf32> to vector<2x40xf32>
    %183 = arith.mulf %166, %182 : vector<2x40xf32>
    %cst_72 = arith.constant dense<0.000000e+00> : vector<2x32xf32>
    %184 = tpu.matmul %183, %180, %cst_72 {dimension_numbers = #tpu.dot_dimension_numbers<[1], [0], [0], [1], [0, 0, 1, 1], [], []>} : vector<2x40xf32>, vector<40x32xf32>, vector<2x32xf32> -> vector<2x32xf32>
    %185 = arith.addf %179, %184 : vector<2x32xf32>
    %c120_73 = arith.constant 120 : index
    %c0_74 = arith.constant 0 : index
    %186 = vector.load %arg2[%c120_73, %c0_74] : memref<384x32xf32, #tpu.memory_space<vmem>>, vector<40x32xf32>
    %187 = vector.extract_strided_slice %147 {offsets = [3, 0], sizes = [1, 40], strides = [1, 1]} : vector<8x40xf32> to vector<1x40xf32>
    %188 = vector.broadcast %187 : vector<1x40xf32> to vector<2x40xf32>
    %189 = arith.mulf %166, %188 : vector<2x40xf32>
    %cst_75 = arith.constant dense<0.000000e+00> : vector<2x32xf32>
    %190 = tpu.matmul %189, %186, %cst_75 {dimension_numbers = #tpu.dot_dimension_numbers<[1], [0], [0], [1], [0, 0, 1, 1], [], []>} : vector<2x40xf32>, vector<40x32xf32>, vector<2x32xf32> -> vector<2x32xf32>
    %191 = arith.addf %185, %190 : vector<2x32xf32>
    %c160 = arith.constant 160 : index
    %c0_76 = arith.constant 0 : index
    %192 = vector.load %arg2[%c160, %c0_76] : memref<384x32xf32, #tpu.memory_space<vmem>>, vector<40x32xf32>
    %193 = vector.extract_strided_slice %147 {offsets = [4, 0], sizes = [1, 40], strides = [1, 1]} : vector<8x40xf32> to vector<1x40xf32>
    %194 = vector.broadcast %193 : vector<1x40xf32> to vector<2x40xf32>
    %195 = arith.mulf %166, %194 : vector<2x40xf32>
    %cst_77 = arith.constant dense<0.000000e+00> : vector<2x32xf32>
    %196 = tpu.matmul %195, %192, %cst_77 {dimension_numbers = #tpu.dot_dimension_numbers<[1], [0], [0], [1], [0, 0, 1, 1], [], []>} : vector<2x40xf32>, vector<40x32xf32>, vector<2x32xf32> -> vector<2x32xf32>
    %197 = arith.addf %191, %196 : vector<2x32xf32>
    %c200 = arith.constant 200 : index
    %c0_78 = arith.constant 0 : index
    %198 = vector.load %arg2[%c200, %c0_78] : memref<384x32xf32, #tpu.memory_space<vmem>>, vector<40x32xf32>
    %199 = vector.extract_strided_slice %147 {offsets = [5, 0], sizes = [1, 40], strides = [1, 1]} : vector<8x40xf32> to vector<1x40xf32>
    %200 = vector.broadcast %199 : vector<1x40xf32> to vector<2x40xf32>
    %201 = arith.mulf %166, %200 : vector<2x40xf32>
    %cst_79 = arith.constant dense<0.000000e+00> : vector<2x32xf32>
    %202 = tpu.matmul %201, %198, %cst_79 {dimension_numbers = #tpu.dot_dimension_numbers<[1], [0], [0], [1], [0, 0, 1, 1], [], []>} : vector<2x40xf32>, vector<40x32xf32>, vector<2x32xf32> -> vector<2x32xf32>
    %203 = arith.addf %197, %202 : vector<2x32xf32>
    %c240 = arith.constant 240 : index
    %c0_80 = arith.constant 0 : index
    %204 = vector.load %arg2[%c240, %c0_80] : memref<384x32xf32, #tpu.memory_space<vmem>>, vector<40x32xf32>
    %205 = vector.extract_strided_slice %147 {offsets = [6, 0], sizes = [1, 40], strides = [1, 1]} : vector<8x40xf32> to vector<1x40xf32>
    %206 = vector.broadcast %205 : vector<1x40xf32> to vector<2x40xf32>
    %207 = arith.mulf %166, %206 : vector<2x40xf32>
    %cst_81 = arith.constant dense<0.000000e+00> : vector<2x32xf32>
    %208 = tpu.matmul %207, %204, %cst_81 {dimension_numbers = #tpu.dot_dimension_numbers<[1], [0], [0], [1], [0, 0, 1, 1], [], []>} : vector<2x40xf32>, vector<40x32xf32>, vector<2x32xf32> -> vector<2x32xf32>
    %209 = arith.addf %203, %208 : vector<2x32xf32>
    %c280 = arith.constant 280 : index
    %c0_82 = arith.constant 0 : index
    %210 = vector.load %arg2[%c280, %c0_82] : memref<384x32xf32, #tpu.memory_space<vmem>>, vector<40x32xf32>
    %211 = vector.extract_strided_slice %147 {offsets = [7, 0], sizes = [1, 40], strides = [1, 1]} : vector<8x40xf32> to vector<1x40xf32>
    %212 = vector.broadcast %211 : vector<1x40xf32> to vector<2x40xf32>
    %213 = arith.mulf %166, %212 : vector<2x40xf32>
    %cst_83 = arith.constant dense<0.000000e+00> : vector<2x32xf32>
    %214 = tpu.matmul %213, %210, %cst_83 {dimension_numbers = #tpu.dot_dimension_numbers<[1], [0], [0], [1], [0, 0, 1, 1], [], []>} : vector<2x40xf32>, vector<40x32xf32>, vector<2x32xf32> -> vector<2x32xf32>
    %215 = arith.addf %209, %214 : vector<2x32xf32>
    %216 = vector.broadcast %149 : vector<1x32xf32> to vector<2x32xf32>
    %217 = arith.addf %215, %216 : vector<2x32xf32>
    %cst_84 = arith.constant 0.000000e+00 : f32
    %218 = vector.broadcast %cst_84 : f32 to vector<2x32xf32>
    %219 = arith.maximumf %217, %218 : vector<2x32xf32>
    %c320 = arith.constant 320 : index
    %c0_85 = arith.constant 0 : index
    %220 = vector.load %arg2[%c320, %c0_85] : memref<384x32xf32, #tpu.memory_space<vmem>>, vector<32x32xf32>
    %cst_86 = arith.constant dense<0.000000e+00> : vector<2x32xf32>
    %221 = tpu.matmul %219, %220, %cst_86 {dimension_numbers = #tpu.dot_dimension_numbers<[1], [0], [0], [1], [0, 0, 1, 1], [], []>} : vector<2x32xf32>, vector<32x32xf32>, vector<2x32xf32> -> vector<2x32xf32>
    %222 = vector.broadcast %150 : vector<1x32xf32> to vector<2x32xf32>
    %223 = arith.addf %221, %222 : vector<2x32xf32>
    %cst_87 = arith.constant dense<0.000000e+00> : vector<32xf32>
    %224 = vector.multi_reduction <add>, %223, %cst_87 [0] : vector<2x32xf32> to vector<32xf32>
    %225 = vector.shape_cast %224 : vector<32xf32> to vector<1x32xf32>
    %cst_88 = arith.constant 2.000000e+00 : f32
    %226 = vector.broadcast %cst_88 : f32 to vector<1x32xf32>
    %227 = arith.divf %225, %226 : vector<1x32xf32>
    %228 = vector.broadcast %227 : vector<1x32xf32> to vector<2x32xf32>
    %229 = arith.subf %223, %228 : vector<2x32xf32>
    %230 = arith.mulf %229, %229 : vector<2x32xf32>
    %cst_89 = arith.constant dense<0.000000e+00> : vector<32xf32>
    %231 = vector.multi_reduction <add>, %230, %cst_89 [0] : vector<2x32xf32> to vector<32xf32>
    %232 = vector.shape_cast %231 : vector<32xf32> to vector<1x32xf32>
    %cst_90 = arith.constant 2.000000e+00 : f32
    %233 = vector.broadcast %cst_90 : f32 to vector<1x32xf32>
    %234 = arith.divf %232, %233 : vector<1x32xf32>
    %235 = vector.broadcast %227 : vector<1x32xf32> to vector<2x32xf32>
    %236 = arith.subf %223, %235 : vector<2x32xf32>
    %cst_91 = arith.constant 9.99999974E-6 : f32
    %237 = vector.broadcast %cst_91 : f32 to vector<1x32xf32>
    %238 = arith.addf %234, %237 : vector<1x32xf32>
    %239 = math.rsqrt %238 : vector<1x32xf32>
    %240 = vector.broadcast %239 : vector<1x32xf32> to vector<2x32xf32>
    %241 = arith.mulf %236, %240 : vector<2x32xf32>
    %242 = vector.broadcast %151 : vector<1x32xf32> to vector<2x32xf32>
    %243 = arith.mulf %241, %242 : vector<2x32xf32>
    %244 = vector.broadcast %152 : vector<1x32xf32> to vector<2x32xf32>
    %245 = arith.addf %243, %244 : vector<2x32xf32>
    %cst_92 = arith.constant 0.000000e+00 : f32
    %246 = vector.broadcast %cst_92 : f32 to vector<2x32xf32>
    %247 = arith.maximumf %245, %246 : vector<2x32xf32>
    %c352 = arith.constant 352 : index
    %c0_93 = arith.constant 0 : index
    %248 = vector.load %arg2[%c352, %c0_93] : memref<384x32xf32, #tpu.memory_space<vmem>>, vector<32x32xf32>
    %cst_94 = arith.constant dense<0.000000e+00> : vector<2x32xf32>
    %249 = tpu.matmul %247, %248, %cst_94 {dimension_numbers = #tpu.dot_dimension_numbers<[1], [0], [0], [1], [0, 0, 1, 1], [], []>} : vector<2x32xf32>, vector<32x32xf32>, vector<2x32xf32> -> vector<2x32xf32>
    %250 = vector.broadcast %153 : vector<1x32xf32> to vector<2x32xf32>
    %251 = arith.addf %249, %250 : vector<2x32xf32>
    %252 = vector.extract_strided_slice %251 {offsets = [0, 0], sizes = [2, 1], strides = [1, 1]} : vector<2x32xf32> to vector<2x1xf32>
    %c0_95 = arith.constant 0 : index
    %c0_96 = arith.constant 0 : index
    %253 = vector.load %arg4[%c0_95, %c0_96] : memref<2x1xf32, #tpu.memory_space<vmem>>, vector<2x1xf32>
    tpu.vector_store %arg4[%c0_95, %c0_96], %252 {strides = array<i32>} : memref<2x1xf32, #tpu.memory_space<vmem>>, vector<2x1xf32>,
    return
  }
}

</mosaic_0001>

<bundles_post_ra>
// kernel: forward.1
= control target key start
LH: loop header
LB: loop body
LE: loop exit
PB: predicated region body
PF: predicated region fallthrough
CT: control target
= control target key end

     0   :  { %v17_v0 = vlaneseq  ;;  %v4102_v1 = vmov 0.0|0.0   ;;  %vm4865_vm0 = vmmov 0   ;;  %v4104_v4 = vmov 0.0   ;;  %s4854_s0 = inlined_call_operand.vmem [shape: f32[8,40], index: 0, kind: input, shape index: {}]   ;;  %s4855_s1 = inlined_call_operand.vmem [shape: f32[144,8], index: 1, kind: input, shape index: {}]   ;;  %s4856_s2 = inlined_call_operand.vmem [shape: f32[384,32], index: 2, kind: input, shape index: {}]   ;;  %s4857_s3 = inlined_call_operand.vmem [shape: f32[5,32], index: 3, kind: input, shape index: {}]   ;;  %s4858_s4 = inlined_call_operand.vmem [shape: f32[2,1], index: 4, kind: output, shape index: {}]  }
   0x1   :  { %3948 = vmatprep.subr.bf16.mxu1 %v4102_v1  ;;  %3942 = vmatprep.subr.bf16.mxu0 %v4102_v1  ;;  %v4105_v14 = vmov 1.0|1.0   ;;  %v4873_v15 = vmov 0  ;;  %v4875_v16 = vmov 0  ;;  %v4877_v18 = vmov 0  ;;  %v4208_v19 = vld [vmem:[%s4854_s0] sm:$0xff] }
   0x2   :  { %v4135_v2 = vshrl.u32 %v17_v0, 7  ;;  %v4137_v3 = vand.u32 127, %v17_v0  ;;  %3569 = vmatprep.mubr.msk.f32.mxu1 %vm4865_vm0, %v4104_v4  ;;  %3556 = vmatprep.mubr.msk.f32.mxu0 %vm4865_vm0, %v4104_v4  ;;  %vm4867_vm15 = vcmask 326656   ;;  %v4106_v20 = vmov 1.0   ;;  %v181_v21 = vld [vmem:[%s4855_s1 + $0x8] sm:$0xff]  ;;  %v106_v23 = vld [vmem:[%s4855_s1] sm:$0xff] }
   0x3   :  { %v399_v34 = vld [vmem:[%s4855_s1 + $0x10] sm:$0xff]  ;;  %v544_v42 = vld [vmem:[%s4855_s1 + $0x18] sm:$0xff]  ;;  %v4107_v48 = vmov 0   ;;  %v1578_v49 = vld [vmem:[%s4855_s1 + $0x80] sm:$0xff] }
   0x4   :  { %v19_v5 = vadd.s32 8, %v4135_v2  ;;  %v4146_v6 = vsub.s32 %v4135_v2, %v4137_v3  ;;  %v20_v7 = vadd.s32 16, %v4135_v2  ;;  %v21_v8 = vadd.s32 24, %v4135_v2  ;;  %v834_v47 = vld [vmem:[%s4855_s1 + $0x78] sm:$0xff]  ;;  %4098 = vset.pattern.permute.xlu0 %v4107_v48  ;;  %4099 = vset.pattern.permute.xlu1 %v4107_v48  ;;  %v689_v53 = vld [vmem:[%s4855_s1 + $0x20] sm:$0xff]  ;;  %v926_v0 = vld [vmem:[%s4855_s1 + $0x30] sm:$0xff] }
   0x5   :  { %v22_v12 = vadd.s32 32, %v4135_v2  ;;  %837 = vperm.xlu0 %4098, %v834_v47   ;;  %v1668_v47 = vld [vmem:[%s4855_s1 + $0x58] sm:$0xff]  ;;  %v1885_v28 = vld [vmem:[%s4855_s1 + $0x60] sm:$0xff]  ;;  %v2030_v38 = vld [vmem:[%s4855_s1 + $0x68] sm:$0xff] }
   0x6   :  { %v4151_v9 = vsub.s32 %v19_v5, %v4137_v3  ;;  %vm45_vm1 = vcmp.eq.s32.totalorder %v4146_v6, 0  ;;  %v4155_v10 = vsub.s32 %v20_v7, %v4137_v3  ;;  %vm30_vm2 = vcmp.eq.s32.totalorder %v4146_v6, 4294967295  ;;  %v2320_v44 = vld [vmem:[%s4855_s1 + $0x88] sm:$0xff] }
   0x7   :  { %v4159_v11 = vsub.s32 %v21_v8, %v4137_v3  ;;  %v4188_v17 = vsub.s32 %v22_v12, %v4137_v3  ;;  %2323 = vperm.xlu1 %4099, %v2320_v44  }
   0x8   :  { %vm46_vm3 = vcmp.eq.s32.totalorder %v4151_v9, 0  ;;  %vm31_vm4 = vcmp.eq.s32.totalorder %v4151_v9, 4294967295  ;;  %vm47_vm5 = vcmp.eq.s32.totalorder %v4155_v10, 0  ;;  %vm32_vm8 = vcmp.eq.s32.totalorder %v4155_v10, 4294967295 }
   0x9   :  { %vm4165_vm6 = vmpackc.low %vm46_vm3, %vm45_vm1  ;;  %vm48_vm7 = vcmp.eq.s32.totalorder %v4159_v11, 0  ;;  %vm33_vm9 = vcmp.eq.s32.totalorder %v4159_v11, 4294967295  ;;  %vm4862_vm13 = vcmp.eq.s32.totalorder %v4188_v17, 0  ;;  %vm4861_vm14 = vcmp.eq.s32.totalorder %v4188_v17, 4294967295  ;;  %1581 = vperm.xlu0 %4098, %v1578_v49  }
   0xa   :  { %3950 = vmatpush3.bf16.msk.msra.mxu1 %vm4165_vm6, %v4105_v14  ;;  %vm4175_vm10 = vmpackc.low %vm31_vm4, %vm30_vm2  ;;  %vm60_vm1 = vcmp.eq.s32.totalorder %v4146_v6, 1  ;;  %vm61_vm2 = vcmp.eq.s32.totalorder %v4151_v9, 1  ;;  %vm4864_vm3 = vcmask 64512  }
   0xb   :  { %v4874_v15 = vsel %vm4175_vm10, 4294967295, %v4873_v15  ;;  %3944 = vmatpush3.bf16.msk.msra.mxu0 %vm4175_vm10, %v4105_v14  ;;  %3951 = vmatprep.subr.bf16.mxu1 %v4102_v1  ;;  %vm4183_vm11 = vmpackc.low %vm48_vm7, %vm47_vm5  ;;  %vm62_vm5 = vcmp.eq.s32.totalorder %v4155_v10, 1  ;;  %vm63_vm7 = vcmp.eq.s32.totalorder %v4159_v11, 1 }
   0xc   :  { %v4876_v16 = vsel %vm4183_vm11, 4294967295, %v4875_v16  ;;  %3945 = vmatprep.subr.bf16.mxu0 %v4102_v1  ;;  %vm4191_vm12 = vmpackc.low %vm33_vm9, %vm32_vm8  ;;  %vm4859_vm9 = vcmp.eq.s32.totalorder %v4188_v17, 1 }
   0xd   :  { %v4878_v18 = vsel %vm4191_vm12, 4294967295, %v4877_v18  ;;  %vm4234_vm4 = vmpackc.low %vm61_vm2, %vm60_vm1  ;;  %vm75_vm1 = vcmp.eq.s32.totalorder %v4146_v6, 2  ;;  %vm76_vm2 = vcmp.eq.s32.totalorder %v4151_v9, 2 }
   0xe   :  { %3953 = vmatpush3.bf16.msk.msra.mxu1 %vm4183_vm11, %v4105_v14  ;;  %vm4249_vm8 = vmpackc.low %vm63_vm7, %vm62_vm5  ;;  %vm77_vm7 = vcmp.eq.s32.totalorder %v4155_v10, 2 }
   0xf   :  { %3947 = vmatpush3.bf16.msk.msra.mxu0 %vm4191_vm12, %v4105_v14  ;;  %3567 = vmatprep.subr.mxu1 %v4104_v4  ;;  %vm4274_vm5 = vmpackc.low %vm76_vm2, %vm75_vm1  ;;  %vm4860_vm2 = vcmp.eq.s32.totalorder %v4188_v17, 2 }
  0x10   :  { %3554 = vmatprep.subr.mxu0 %v4104_v4 }
  0x12   :  { %3568 = vmatpush3.msk.msra.mxu1 %vm4862_vm13, %v4106_v20  ;;  %vm93_vm13 = vcmp.eq.s32.totalorder %v4159_v11, 3 }
  0x13   :  { %3555 = vmatpush3.msk.msra.mxu0 %vm4861_vm14, %v4106_v20  ;;  %3570 = vmatmul.mubr.msk.f32.vlgmr.msra.gmra.mrb[0].mxu1 %vm4867_vm15, %v4208_v19  ;;  %vm92_vm14 = vcmp.eq.s32.totalorder %v4155_v10, 3  ;;  %v1143_v10 = vld [vmem:[%s4855_s1 + $0x38] sm:$0xff] }
  0x14   :  { %3557 = vmatmul.mubr.msk.f32.vlgmr.msra.gmra.mrb[0].mxu0 %vm4867_vm15, %v4208_v19  ;;  %3572 = vmatprep.subr.mxu0 %v4104_v4 }
  0x15   :  { %3574 = vmatprep.mubr.msk.f32.mxu0 %vm4865_vm0, %v4104_v4  ;;  %3577 = vmatprep.subr.mxu1 %v4104_v4 }
  0x16   :  { %3579 = vmatprep.mubr.msk.f32.mxu1 %vm4865_vm0, %v4104_v4 }
  0x84   :  { %v838_v59 = vpop.permute.xlu0 %837 }
  0xe6   :  { %v248_v22 = vpop.f32.mrb[0].mxu1 }
  0xe7   :  { %v177_v24 = vpop.f32.mrb[0].mxu0  ;;  %v3571_v25 = vpop.f32.mrb[1].mxu1  ;;  %3573 = vmatpush3.msra.mxu0 %v248_v22 }
  0xe8   :  { %3575 = vmatmul.mubr.msk.f32.vlgmr.msra.gmra.mrb[2].mxu0 %vm4864_vm3, %v181_v21  ;;  %3578 = vmatpush3.msra.mxu1 %v177_v24  ;;  %v3558_v27 = vpop.f32.mrb[1].mxu0 }
  0xe9   :  { %3954 = vmatprep.subr.bf16.mxu0 %v4102_v1  ;;  %3580 = vmatmul.mubr.msk.f32.vlgmr.msra.gmra.mrb[2].mxu1 %vm4864_vm3, %v106_v23 }
  0xea   :  { %3956 = vmatpush3.bf16.msk.msra.mxu0 %vm4234_vm4, %v4105_v14  ;;  %3592 = vmatprep.mubr.msk.f32.mxu0 %vm4865_vm0, %v4104_v4 }
  0xeb   :  { %3957 = vmatprep.subr.bf16.mxu0 %v4102_v1  ;;  %3595 = vmatprep.subr.mxu1 %v4104_v4 }
  0xec   :  { %3597 = vmatprep.mubr.msk.f32.mxu1 %vm4865_vm0, %v4104_v4 }
  0xee   :  { %3959 = vmatpush3.bf16.msk.msra.mxu0 %vm4249_vm8, %v4105_v14 }
  0xef   :  { %3590 = vmatprep.subr.mxu0 %v4104_v4 }
  0xf2   :  { %3591 = vmatpush3.msk.msra.mxu0 %vm4859_vm9, %v4106_v20  ;;  %vm78_vm9 = vcmp.eq.s32.totalorder %v4159_v11, 2 }
  0xf3   :  { %3593 = vmatmul.mubr.msk.f32.vlgmr.msra.gmra.mrb[4].mxu0 %vm4867_vm15, %v4208_v19  ;;  %3613 = vmatprep.subr.mxu0 %v4104_v4  ;;  %vm4288_vm1 = vmpackc.low %vm78_vm9, %vm77_vm7  ;;  %vm90_vm9 = vcmp.eq.s32.totalorder %v4146_v6, 3  ;;  %vm91_vm7 = vcmp.eq.s32.totalorder %v4151_v9, 3  ;;  %v852_v9 = vld [vmem:[%s4855_s1 + $0x28] sm:$0xff] }
  0xf4   :  { %3615 = vmatprep.mubr.msk.f32.mxu0 %vm4865_vm0, %v4104_v4 }
 0x1bb   :  { %v322_v29 = vpop.f32.mrb[2].mxu0 }
 0x1bc   :  { %v3576_v30 = vpop.f32.mrb[3].mxu0  ;;  %v395_v31 = vpop.f32.mrb[2].mxu1 }
 0x1bd   :  { %v396_v32 = vadd.f32 %v395_v31, %v322_v29  ;;  %v3581_v33 = vpop.f32.mrb[3].mxu1  ;;  %v1288_v30 = vld [vmem:[%s4855_s1 + $0x40] sm:$0xff] }
 0x1c6   :  { %v466_v35 = vpop.f32.mrb[4].mxu0 }
 0x1c7   :  { %v3594_v37 = vpop.f32.mrb[5].mxu0  ;;  %3596 = vmatpush3.msra.mxu1 %v466_v35  ;;  %v1433_v35 = vld [vmem:[%s4855_s1 + $0x48] sm:$0xff] }
 0x1c8   :  { %3598 = vmatmul.mubr.msk.f32.vlgmr.msra.gmra.mrb[4].mxu1 %vm4864_vm3, %v399_v34  ;;  %3960 = vmatprep.subr.bf16.mxu1 %v4102_v1 }
 0x1c9   :  { %3962 = vmatpush3.bf16.msk.msra.mxu1 %vm4274_vm5, %v4105_v14  ;;  %3610 = vmatprep.mubr.msk.f32.mxu1 %vm4865_vm0, %v4104_v4 }
 0x1ca   :  { %3963 = vmatprep.subr.bf16.mxu1 %v4102_v1 }
 0x1cd   :  { %3965 = vmatpush3.bf16.msk.msra.mxu1 %vm4288_vm1, %v4105_v14 }
 0x1ce   :  { %3608 = vmatprep.subr.mxu1 %v4104_v4 }
 0x1d1   :  { %3609 = vmatpush3.msk.msra.mxu1 %vm4860_vm2, %v4106_v20  ;;  %vm4310_vm2 = vmpackc.low %vm91_vm7, %vm90_vm9  ;;  %vm4863_vm7 = vcmp.eq.s32.totalorder %v4188_v17, 3 }
 0x1d2   :  { %3611 = vmatmul.mubr.msk.f32.vlgmr.msra.gmra.mrb[6].mxu1 %vm4867_vm15, %v4208_v19  ;;  %3631 = vmatprep.subr.mxu1 %v4104_v4  ;;  %vm4324_vm9 = vmpackc.low %vm93_vm13, %vm92_vm14  ;;  %vm4891_vm13 = vcmp.eq.s32.totalorder %v4188_v17, 0  ;;  %vm4892_vm14 = vcmp.eq.s32.totalorder %v4188_v17, 4294967295 }
 0x1d3   :  { %3633 = vmatprep.mubr.msk.f32.mxu1 %vm4865_vm0, %v4104_v4 }
 0x29b   :  { %v539_v39 = vpop.f32.mrb[4].mxu1 }
 0x29c   :  { %v543_v40 = vadd.f32 %v539_v39, %v396_v32  ;;  %v3599_v41 = vpop.f32.mrb[5].mxu1 }
 0x2a5   :  { %v611_v43 = vpop.f32.mrb[6].mxu1 }
 0x2a6   :  { %v3612_v45 = vpop.f32.mrb[7].mxu1  ;;  %3614 = vmatpush3.msra.mxu0 %v611_v43 }
 0x2a7   :  { %3616 = vmatmul.mubr.msk.f32.vlgmr.msra.gmra.mrb[6].mxu0 %vm4864_vm3, %v544_v42  ;;  %3966 = vmatprep.subr.bf16.mxu0 %v4102_v1 }
 0x2a8   :  { %3968 = vmatpush3.bf16.msk.msra.mxu0 %vm4310_vm2, %v4105_v14  ;;  %3628 = vmatprep.mubr.msk.f32.mxu0 %vm4865_vm0, %v4104_v4 }
 0x2a9   :  { %3969 = vmatprep.subr.bf16.mxu0 %v4102_v1 }
 0x2ac   :  { %3971 = vmatpush3.bf16.msk.msra.mxu0 %vm4324_vm9, %v4105_v14 }
 0x2ad   :  { %3626 = vmatprep.subr.mxu0 %v4104_v4 }
 0x2b0   :  { %3627 = vmatpush3.msk.msra.mxu0 %vm4863_vm7, %v4106_v20  ;;  %vm843_vm7 = vcmp.lt.s32.totalorder %v4137_v3, 15 }
 0x2b1   :  { %3629 = vmatmul.mubr.msk.f32.vlgmr.msra.gmra.mrb[8].mxu0 %vm4867_vm15, %v4208_v19  ;;  %3978 = vmatprep.subr.bf16.mxu0 %v4102_v1 }
 0x2b2   :  { %3980 = vmatpush3.bf16.msk.msra.mxu0 %vm4165_vm6, %v4105_v14  ;;  %3659 = vmatprep.mubr.msk.f32.mxu0 %vm4865_vm0, %v4104_v4 }
 0x2b3   :  { %3981 = vmatprep.subr.bf16.mxu0 %v4102_v1 }
 0x2b6   :  { %3983 = vmatpush3.bf16.msk.msra.mxu0 %vm4183_vm11, %v4105_v14 }
 0x2b7   :  { %3657 = vmatprep.subr.mxu0 %v4104_v4 }
 0x2ba   :  { %3658 = vmatpush3.msk.msra.mxu0 %vm4891_vm13, %v4106_v20  ;;  %vm842_vm13 = vcmp.ge.s32.totalorder %v4137_v3, 1 }
 0x2bb   :  { %3984 = vmatprep.subr.bf16.mxu0 %v4102_v1  ;;  %vm844_vm15 = vmand %vm842_vm13, %vm843_vm7 }
 0x37a   :  { %v684_v50 = vpop.f32.mrb[6].mxu0 }
 0x37b   :  { %v688_v51 = vadd.f32 %v684_v50, %v543_v40  ;;  %v3617_v52 = vpop.f32.mrb[7].mxu0  ;;  %v1582_v40 = vpop.permute.xlu0 %1581  ;;  %v1594_v50 = vld [vmem:[%s4855_s1 + $0x50] sm:$0xff] }
 0x384   :  { %v756_v54 = vpop.f32.mrb[8].mxu0 }
 0x385   :  { %v3630_v55 = vpop.f32.mrb[9].mxu0  ;;  %3632 = vmatpush3.msra.mxu1 %v756_v54 }
 0x386   :  { %3634 = vmatmul.mubr.msk.f32.vlgmr.msra.gmra.mrb[8].mxu1 %vm4864_vm3, %v689_v53  ;;  %3972 = vmatprep.subr.bf16.mxu1 %v4102_v1  ;;  %vm845_vm3 = vcmp.ge.s32.totalorder %v4137_v3, 19 }
 0x387   :  { %3974 = vmatpush3.bf16.msk.msra.mxu1 %vm4175_vm10, %v4105_v14  ;;  %3646 = vmatprep.mubr.msk.f32.mxu1 %vm4865_vm0, %v4104_v4  ;;  %vm846_vm0 = vcmp.lt.s32.totalorder %v4137_v3, 33 }
 0x388   :  { %3975 = vmatprep.subr.bf16.mxu1 %v4102_v1 }
 0x38b   :  { %3977 = vmatpush3.bf16.msk.msra.mxu1 %vm4191_vm12, %v4105_v14  ;;  %vm847_vm12 = vmand %vm845_vm3, %vm846_vm0  ;;  %vm4895_vm0 = vmmov 0  }
 0x38c   :  { %3644 = vmatprep.subr.mxu1 %v4104_v4  ;;  %vm848_vm10 = vmor %vm844_vm15, %vm847_vm12  ;;  %vm4897_vm12 = vcmask 64512  }
 0x38d   :  { %v3284_v61 = vsel %vm848_vm10, 1.0, %v4104_v4  ;;  %vm4896_vm10 = vcmp.eq.s32.totalorder %v4188_v17, 1  ;;  %vm4898_vm15 = vmmov %vm4897_vm12 }
 0x38e   :  { %vm4899_vm7 = vmmov %vm4897_vm12 }
 0x38f   :  { %3645 = vmatpush3.msk.msra.mxu1 %vm4892_vm14, %v4106_v20  ;;  %vm4893_vm14 = vcmask 326656  }
 0x390   :  { %3662 = vmatprep.subr.mxu1 %v4104_v4  ;;  %vm4894_vm11 = vmmov %vm4893_vm14 }
 0x459   :  { %v829_v56 = vpop.f32.mrb[8].mxu1 }
 0x45a   :  { %v833_v57 = vadd.f32 %v829_v56, %v688_v51  ;;  %v3635_v58 = vpop.f32.mrb[9].mxu1 }
 0x45c   :  { %v840_v60 = vadd.f32 %v838_v59, %v833_v57 }
 0x45e   :  { %v841_v62 = vmax.f32 %v840_v60, 0.0 }
 0x460   :  { %v851_v63 = vmul.f32 %v3284_v61, %v841_v62 }
 0x462   :  { %3647 = vmatmul.mubr.msk.f32.vlgmr.msra.gmra.mrb[10].mxu1 %vm4893_vm14, %v851_v63  ;;  %3660 = vmatmul.mubr.msk.f32.vlgmr.msra.gmra.mrb[10].mxu0 %vm4894_vm11, %v851_v63  ;;  %vm4900_vm14 = vcmp.eq.s32.totalorder %v4188_v17, 2 }
 0x463   :  { %3986 = vmatpush3.bf16.msk.msra.mxu0 %vm4234_vm4, %v4105_v14  ;;  %3682 = vmatprep.mubr.msk.f32.mxu0 %vm4895_vm0, %v4104_v4 }
 0x464   :  { %3987 = vmatprep.subr.bf16.mxu0 %v4102_v1  ;;  %3664 = vmatprep.mubr.msk.f32.mxu1 %vm4895_vm0, %v4104_v4 }
 0x467   :  { %3989 = vmatpush3.bf16.msk.msra.mxu0 %vm4249_vm8, %v4105_v14 }
 0x468   :  { %3680 = vmatprep.subr.mxu0 %v4104_v4 }
 0x46b   :  { %3681 = vmatpush3.msk.msra.mxu0 %vm4896_vm10, %v4106_v20  ;;  %vm4901_vm10 = vmmov %vm4894_vm11 }
 0x46c   :  { %3683 = vmatmul.mubr.msk.f32.vlgmr.msra.gmra.mrb[12].mxu0 %vm4894_vm11, %v851_v63  ;;  %3703 = vmatprep.subr.mxu0 %v4104_v4  ;;  %vm4902_vm11 = vmmov %vm4899_vm7 }
 0x46d   :  { %3705 = vmatprep.mubr.msk.f32.mxu0 %vm4895_vm0, %v4104_v4 }
 0x535   :  { %v922_v5 = vpop.f32.mrb[10].mxu1  ;;  %v993_v6 = vpop.f32.mrb[10].mxu0 }
 0x536   :  { %v3648_v7 = vpop.f32.mrb[11].mxu1  ;;  %v3661_v8 = vpop.f32.mrb[11].mxu0  ;;  %3663 = vmatpush3.msra.mxu1 %v993_v6  ;;  %v2356_v6 = vld [vmem:[%s4856_s2 + $0x30] sm:$0xff] }
 0x537   :  { %3665 = vmatmul.mubr.msk.f32.vlgmr.msra.gmra.mrb[12].mxu1 %vm4897_vm12, %v926_v0  ;;  %3667 = vmatprep.subr.mxu1 %v4104_v4  ;;  %vm4903_vm12 = vcmp.eq.s32.totalorder %v4188_v17, 3  ;;  %v2345_v7 = vld [vmem:[%s4856_s2] sm:$0xff] }
 0x538   :  { %3668 = vmatpush3.msra.mxu1 %v922_v5  ;;  %3669 = vmatprep.mubr.msk.f32.mxu1 %vm4895_vm0, %v4104_v4  ;;  %v2355_v5 = vld [vmem:[%s4856_s2 + $0x28] sm:$0xff] }
 0x539   :  { %3685 = vmatprep.subr.mxu1 %v4104_v4  ;;  %v4033_v8 = vpack.c.bf16 %v2356_v6, %v2355_v5  ;;  %v2766_v5 = vld [vmem:[%s4856_s2 + $0xe0] sm:$0xff]  ;;  %v2686_v6 = vsub.s32 4, %v4135_v2 }
 0x53b   :  { %3670 = vmatmul.mubr.msk.f32.vlgmr.msra.gmra.mrb[14].mxu1 %vm4898_vm15, %v852_v9  ;;  %vm4904_vm15 = vmmov %vm4901_vm10  ;;  %v2346_v9 = vld [vmem:[%s4856_s2 + $0x8] sm:$0xff] }
 0x53c   :  { %3687 = vmatprep.mubr.msk.f32.mxu1 %vm4895_vm0, %v4104_v4 }
 0x53f   :  { %v1210_v11 = vpop.f32.mrb[12].mxu0 }
 0x540   :  { %v3684_v12 = vpop.f32.mrb[13].mxu0  ;;  %3686 = vmatpush3.msra.mxu1 %v1210_v11  ;;  %v2357_v11 = vld [vmem:[%s4856_s2 + $0x38] sm:$0xff] }
 0x541   :  { %3688 = vmatmul.mubr.msk.f32.vlgmr.msra.gmra.mrb[16].mxu1 %vm4899_vm7, %v1143_v10  ;;  %3990 = vmatprep.subr.bf16.mxu1 %v4102_v1  ;;  %vm4905_vm7 = vnez %v4876_v16  ;;  %v4039_v10 = vpack.c.bf16 %v2346_v9, %v2345_v7  ;;  %v2358_v12 = vld [vmem:[%s4856_s2 + $0x40] sm:$0xff]  ;;  %v2770_v7 = vsub.s32 5, %v4135_v2 }
 0x542   :  { %3992 = vmatpush3.bf16.msk.msra.mxu1 %vm4274_vm5, %v4105_v14  ;;  %3700 = vmatprep.mubr.msk.f32.mxu1 %vm4895_vm0, %v4104_v4 }
 0x543   :  { %3993 = vmatprep.subr.bf16.mxu1 %v4102_v1 }
 0x546   :  { %3995 = vmatpush3.bf16.msk.msra.mxu1 %vm4288_vm1, %v4105_v14 }
 0x547   :  { %3698 = vmatprep.subr.mxu1 %v4104_v4 }
 0x54a   :  { %3699 = vmatpush3.msk.msra.mxu1 %vm4900_vm14, %v4106_v20  ;;  %vm4906_vm14 = vcmp.eq.s32.totalorder %v4188_v17, 0 }
 0x54b   :  { %3701 = vmatmul.mubr.msk.f32.vlgmr.msra.gmra.mrb[18].mxu1 %vm4901_vm10, %v851_v63  ;;  %3721 = vmatprep.subr.mxu1 %v4104_v4  ;;  %vm4908_vm10 = vnez %v4874_v15 }
 0x54c   :  { %3723 = vmatprep.mubr.msk.f32.mxu1 %vm4895_vm0, %v4104_v4 }
 0x60a   :  { %v1066_v19 = vpop.f32.mrb[12].mxu1 }
 0x60b   :  { %v3666_v21 = vpop.f32.mrb[13].mxu1 }
 0x60c   :  { %v2347_v21 = vld [vmem:[%s4856_s2 + $0x10] sm:$0xff] }
 0x60e   :  { %v1139_v22 = vpop.f32.mrb[14].mxu1 }
 0x60f   :  { %v1140_v23 = vadd.f32 %v1139_v22, %v1066_v19  ;;  %v3671_v24 = vpop.f32.mrb[15].mxu1  ;;  %v4036_v19 = vpack.c.bf16 %v2358_v12, %v2357_v11  ;;  %v2348_v22 = vld [vmem:[%s4856_s2 + $0x18] sm:$0xff]  ;;  %v2847_v12 = vld [vmem:[%s4856_s2 + $0xf0] sm:$0xff] }
 0x610   :  { %v2359_v24 = vld [vmem:[%s4856_s2 + $0x48] sm:$0xff] }
 0x614   :  { %v1283_v25 = vpop.f32.mrb[16].mxu1 }
 0x615   :  { %v1287_v27 = vadd.f32 %v1283_v25, %v1140_v23  ;;  %v3689_v29 = vpop.f32.mrb[17].mxu1  ;;  %v4042_v23 = vpack.c.bf16 %v2348_v22, %v2347_v21  ;;  %v2349_v25 = vld [vmem:[%s4856_s2 + $0x20] sm:$0xff]  ;;  %v2931_v21 = vld [vmem:[%s4856_s2 + $0x118] sm:$0xff] }
 0x616   :  { %v2932_v22 = vld [vmem:[%s4856_s2 + $0x120] sm:$0xff] }
 0x61e   :  { %v1355_v31 = vpop.f32.mrb[18].mxu1 }
 0x61f   :  { %v3702_v32 = vpop.f32.mrb[19].mxu1  ;;  %3704 = vmatpush3.msra.mxu0 %v1355_v31 }
 0x620   :  { %3706 = vmatmul.mubr.msk.f32.vlgmr.msra.gmra.mrb[14].mxu0 %vm4902_vm11, %v1288_v30  ;;  %3996 = vmatprep.subr.bf16.mxu0 %v4102_v1  ;;  %v2324_v32 = vpop.permute.xlu1 %2323 }
 0x621   :  { %3998 = vmatpush3.bf16.msk.msra.mxu0 %vm4310_vm2, %v4105_v14  ;;  %3718 = vmatprep.mubr.msk.f32.mxu0 %vm4895_vm0, %v4104_v4 }
 0x622   :  { %3999 = vmatprep.subr.bf16.mxu0 %v4102_v1 }
 0x625   :  { %4001 = vmatpush3.bf16.msk.msra.mxu0 %vm4324_vm9, %v4105_v14 }
 0x626   :  { %3716 = vmatprep.subr.mxu0 %v4104_v4 }
 0x629   :  { %3717 = vmatpush3.msk.msra.mxu0 %vm4903_vm12, %v4106_v20  ;;  %vm4910_vm12 = vcmp.eq.s32.totalorder %v4188_v17, 4294967295 }
 0x62a   :  { %3719 = vmatmul.mubr.msk.f32.vlgmr.msra.gmra.mrb[16].mxu0 %vm4904_vm15, %v851_v63  ;;  %4008 = vmatprep.subr.bf16.mxu0 %v4102_v1  ;;  %vm1586_vm15 = vcmp.lt.s32.totalorder %v4137_v3, 13 }
 0x62b   :  { %4010 = vmatpush3.bf16.msk.msra.mxu0 %vm4165_vm6, %v4105_v14  ;;  %3749 = vmatprep.mubr.msk.f32.mxu0 %vm4895_vm0, %v4104_v4  ;;  %vm4907_vm6 = vmmov %vm4902_vm11  ;;  %vm4909_vm11 = vnez %v4878_v18 }
 0x62c   :  { %4011 = vmatprep.subr.bf16.mxu0 %v4102_v1 }
 0x62f   :  { %4013 = vmatpush3.bf16.msk.msra.mxu0 %vm4905_vm7, %v4105_v14  ;;  %vm1588_vm7 = vcmp.lt.s32.totalorder %v4137_v3, 31 }
 0x630   :  { %3747 = vmatprep.subr.mxu0 %v4104_v4 }
 0x633   :  { %3748 = vmatpush3.msk.msra.mxu0 %vm4906_vm14, %v4106_v20  ;;  %vm1587_vm14 = vmand %vm842_vm13, %vm1586_vm15  ;;  %vm4913_vm15 = vcmask 64512  }
 0x634   :  { %3757 = vmatprep.subr.mxu0 %v4104_v4 }
 0x6f3   :  { %v1428_v33 = vpop.f32.mrb[14].mxu0 }
 0x6f4   :  { %v1432_v13 = vadd.f32 %v1428_v33, %v1287_v27  ;;  %v3707_v34 = vpop.f32.mrb[15].mxu0  ;;  %v2337_v27 = vmul.u32 18, %v4135_v2 }
 0x6f6   :  { %v2338_v29 = vadd.s32 1, %v2337_v27 }
 0x6f8   :  { %v2340_v30 = vadd.s32 10, %v2338_v29 }
 0x6fd   :  { %v1500_v37 = vpop.f32.mrb[16].mxu0 }
 0x6fe   :  { %v3720_v39 = vpop.f32.mrb[17].mxu0  ;;  %3722 = vmatpush3.msra.mxu1 %v1500_v37 }
 0x6ff   :  { %3724 = vmatmul.mubr.msk.f32.vlgmr.msra.gmra.mrb[20].mxu1 %vm4907_vm6, %v1433_v35  ;;  %4002 = vmatprep.subr.bf16.mxu1 %v4102_v1  ;;  %vm1589_vm6 = vmand %vm845_vm3, %vm1588_vm7  ;;  %v2362_v39 = vsub.s32 1, %v4135_v2 }
 0x700   :  { %4004 = vmatpush3.bf16.msk.msra.mxu1 %vm4908_vm10, %v4105_v14  ;;  %3736 = vmatprep.mubr.msk.f32.mxu1 %vm4895_vm0, %v4104_v4  ;;  %vm1590_vm10 = vmor %vm1587_vm14, %vm1589_vm6  ;;  %vm4915_vm14 = vcmp.eq.s32.totalorder %v4188_v17, 1  ;;  %vm4918_vm6 = vcmp.eq.s32.totalorder %v4188_v17, 2 }
 0x701   :  { %4005 = vmatprep.subr.bf16.mxu1 %v4102_v1  ;;  %v3320_v42 = vsel %vm1590_vm10, 1.0, %v4104_v4  ;;  %vm4914_vm7 = vmmov %vm4913_vm15 }
 0x704   :  { %4007 = vmatpush3.bf16.msk.msra.mxu1 %vm4909_vm11, %v4105_v14  ;;  %vm4911_vm11 = vcmask 326656  }
 0x705   :  { %3734 = vmatprep.subr.mxu1 %v4104_v4 }
 0x708   :  { %3735 = vmatpush3.msk.msra.mxu1 %vm4910_vm12, %v4106_v20  ;;  %vm4912_vm12 = vmmov %vm4911_vm11 }
 0x709   :  { %3752 = vmatprep.subr.mxu1 %v4104_v4 }
 0x7d2   :  { %v1573_v15 = vpop.f32.mrb[20].mxu1 }
 0x7d3   :  { %v1577_v16 = vadd.f32 %v1573_v15, %v1432_v13  ;;  %v3725_v18 = vpop.f32.mrb[21].mxu1  ;;  %v2352_v15 = vsub.s32 0, %v4135_v2 }
 0x7d5   :  { %v1584_v41 = vadd.f32 %v1582_v40, %v1577_v16  ;;  %v2511_v16 = vld [vmem:[%s4856_s2 + $0x50] sm:$0xff]  ;;  %v2512_v40 = vld [vmem:[%s4856_s2 + $0x58] sm:$0xff] }
 0x7d7   :  { %v1585_v43 = vmax.f32 %v1584_v41, 0.0  ;;  %v2596_v41 = vld [vmem:[%s4856_s2 + $0x80] sm:$0xff] }
 0x7d9   :  { %v1593_v45 = vmul.f32 %v3320_v42, %v1585_v43 }
 0x7db   :  { %3737 = vmatmul.mubr.msk.f32.vlgmr.msra.gmra.mrb[22].mxu1 %vm4911_vm11, %v1593_v45  ;;  %3750 = vmatmul.mubr.msk.f32.vlgmr.msra.gmra.mrb[18].mxu0 %vm4912_vm12, %v1593_v45  ;;  %vm2330_vm12 = vcmp.lt.s32.totalorder %v4137_v3, 29 }
 0x7dc   :  { %3754 = vmatprep.mubr.msk.f32.mxu1 %vm4895_vm0, %v4104_v4  ;;  %3759 = vmatprep.mubr.msk.f32.mxu0 %vm4895_vm0, %v4104_v4 }
 0x8ae   :  { %v1664_v48 = vpop.f32.mrb[22].mxu1  ;;  %v1735_v49 = vpop.f32.mrb[18].mxu0 }
 0x8af   :  { %v3738_v51 = vpop.f32.mrb[23].mxu1  ;;  %v3751_v52 = vpop.f32.mrb[19].mxu0  ;;  %3753 = vmatpush3.msra.mxu1 %v1735_v49  ;;  %3758 = vmatpush3.msra.mxu0 %v1664_v48  ;;  %v2513_v49 = vld [vmem:[%s4856_s2 + $0x60] sm:$0xff] }
 0x8b0   :  { %3755 = vmatmul.mubr.msk.f32.vlgmr.msra.gmra.mrb[24].mxu1 %vm4913_vm15, %v1668_v47  ;;  %4014 = vmatprep.subr.bf16.mxu1 %v4102_v1  ;;  %v4045_v47 = vpack.c.bf16 %v2512_v40, %v2511_v16  ;;  %v2514_v52 = vld [vmem:[%s4856_s2 + $0x68] sm:$0xff] }
 0x8b1   :  { %3760 = vmatmul.mubr.msk.f32.vlgmr.msra.gmra.mrb[20].mxu0 %vm4914_vm7, %v1594_v50  ;;  %4016 = vmatpush3.bf16.msk.msra.mxu1 %vm4234_vm4, %v4105_v14  ;;  %vm4916_vm4 = vmmov %vm4911_vm11 }
 0x8b2   :  { %4017 = vmatprep.subr.bf16.mxu1 %v4102_v1  ;;  %3772 = vmatprep.mubr.msk.f32.mxu1 %vm4895_vm0, %v4104_v4  ;;  %vm4919_vm10 = vmmov %vm4916_vm4 }
 0x8b3   :  { %3775 = vmatprep.subr.mxu0 %v4104_v4  ;;  %3777 = vmatprep.mubr.msk.f32.mxu0 %vm4895_vm0, %v4104_v4  ;;  %vm4922_vm11 = vmmov %vm4916_vm4 }
 0x8b5   :  { %4019 = vmatpush3.bf16.msk.msra.mxu1 %vm4249_vm8, %v4105_v14  ;;  %vm4917_vm8 = vmmov %vm4914_vm7 }
 0x8b6   :  { %3770 = vmatprep.subr.mxu1 %v4104_v4 }
 0x8b9   :  { %3771 = vmatpush3.msk.msra.mxu1 %vm4915_vm14, %v4106_v20 }
 0x8ba   :  { %3773 = vmatmul.mubr.msk.f32.vlgmr.msra.gmra.mrb[26].mxu1 %vm4916_vm4, %v1593_v45  ;;  %3793 = vmatprep.subr.mxu1 %v4104_v4  ;;  %vm2339_vm4 = vcmp.ge.s32.totalorder %v4137_v3, %v2338_v29 }
 0x8bb   :  { %3795 = vmatprep.mubr.msk.f32.mxu1 %vm4895_vm0, %v4104_v4 }
 0x983   :  { %v1808_v26 = vpop.f32.mrb[24].mxu1 }
 0x984   :  { %v3756_v53 = vpop.f32.mrb[25].mxu1  ;;  %v1881_v54 = vpop.f32.mrb[20].mxu0 }
 0x985   :  { %v1882_v55 = vadd.f32 %v1881_v54, %v1808_v26  ;;  %v3761_v56 = vpop.f32.mrb[21].mxu0  ;;  %v2597_v26 = vld [vmem:[%s4856_s2 + $0x88] sm:$0xff]  ;;  %v2598_v53 = vld [vmem:[%s4856_s2 + $0x90] sm:$0xff]  ;;  %v2518_v54 = vsub.s32 2, %v4135_v2 }
 0x986   :  { %v4048_v56 = vpack.c.bf16 %v2514_v52, %v2513_v49  ;;  %v3023_v49 = vld [vmem:[%s4856_s2 + $0x150] sm:$0xff] }
 0x98d   :  { %v1952_v57 = vpop.f32.mrb[26].mxu1 }
 0x98e   :  { %v3774_v58 = vpop.f32.mrb[27].mxu1  ;;  %3776 = vmatpush3.msra.mxu0 %v1952_v57 }
 0x98f   :  { %3778 = vmatmul.mubr.msk.f32.vlgmr.msra.gmra.mrb[22].mxu0 %vm4917_vm8, %v1885_v28  ;;  %4020 = vmatprep.subr.bf16.mxu0 %v4102_v1  ;;  %vm2341_vm8 = vcmp.lt.s32.totalorder %v4137_v3, %v2340_v30  ;;  %v4054_v28 = vpack.c.bf16 %v2598_v53, %v2597_v26  ;;  %v4075_v30 = vpack.c.bf16 %v2932_v22, %v2931_v21  ;;  %v3140_v22 = vld [vmem:[%s4856_s2 + $0x178] sm:$0xff] }
 0x990   :  { %4022 = vmatpush3.bf16.msk.msra.mxu0 %vm4274_vm5, %v4105_v14  ;;  %3790 = vmatprep.mubr.msk.f32.mxu0 %vm4895_vm0, %v4104_v4  ;;  %vm4920_vm5 = vmmov %vm4914_vm7 }
 0x991   :  { %4023 = vmatprep.subr.bf16.mxu0 %v4102_v1  ;;  %vm2331_vm7 = vmand %vm845_vm3, %vm2330_vm12  ;;  %vm3103_vm12 = vcmask 254976  }
 0x992   :  { %vm4924_vm3 = vmmov %vm4919_vm10 }
 0x994   :  { %4025 = vmatpush3.bf16.msk.msra.mxu0 %vm4288_vm1, %v4105_v14  ;;  %vm4921_vm1 = vcmp.eq.s32.totalorder %v4188_v17, 3  ;;  %v2175_v17 = vld [vmem:[%s4855_s1 + $0x70] sm:$0xff] }
 0x995   :  { %3788 = vmatprep.subr.mxu0 %v4104_v4 }
 0x998   :  { %3789 = vmatpush3.msk.msra.mxu0 %vm4918_vm6, %v4106_v20  ;;  %vm2342_vm6 = vmand %vm2339_vm4, %vm2341_vm8 }
 0x999   :  { %3791 = vmatmul.mubr.msk.f32.vlgmr.msra.gmra.mrb[24].mxu0 %vm4919_vm10, %v1593_v45  ;;  %3811 = vmatprep.subr.mxu0 %v4104_v4  ;;  %v4656_v42 = vsel %vm2342_vm6, 1.0, %v4104_v4  ;;  %vm4926_vm10 = vmmov %vm4924_vm3 }
 0x99a   :  { %3813 = vmatprep.mubr.msk.f32.mxu0 %vm4895_vm0, %v4104_v4 }
 0xa62   :  { %v2025_v36 = vpop.f32.mrb[22].mxu0 }
 0xa63   :  { %v2029_v59 = vadd.f32 %v2025_v36, %v1882_v55  ;;  %v3779_v60 = vpop.f32.mrb[23].mxu0  ;;  %v2602_v55 = vsub.s32 3, %v4135_v2  ;;  %v2679_v36 = vld [vmem:[%s4856_s2 + $0xa0] sm:$0xff] }
 0xa64   :  { %v2763_v60 = vld [vmem:[%s4856_s2 + $0xc8] sm:$0xff] }
 0xa6c   :  { %v2097_v61 = vpop.f32.mrb[24].mxu0 }
 0xa6d   :  { %v3792_v62 = vpop.f32.mrb[25].mxu0  ;;  %3794 = vmatpush3.msra.mxu1 %v2097_v61  ;;  %v2515_v61 = vld [vmem:[%s4856_s2 + $0x70] sm:$0xff] }
 0xa6e   :  { %3796 = vmatmul.mubr.msk.f32.vlgmr.msra.gmra.mrb[28].mxu1 %vm4920_vm5, %v2030_v38  ;;  %4026 = vmatprep.subr.bf16.mxu1 %v4102_v1  ;;  %v2764_v38 = vld [vmem:[%s4856_s2 + $0xd0] sm:$0xff]  ;;  %v2599_v62 = vld [vmem:[%s4856_s2 + $0x98] sm:$0xff] }
 0xa6f   :  { %4028 = vmatpush3.bf16.msk.msra.mxu1 %vm4310_vm2, %v4105_v14  ;;  %3808 = vmatprep.mubr.msk.f32.mxu1 %vm4895_vm0, %v4104_v4  ;;  %vm4923_vm2 = vmmov %vm4920_vm5 }
 0xa70   :  { %4029 = vmatprep.subr.bf16.mxu1 %v4102_v1  ;;  %vm4927_vm5 = vmmov %vm4924_vm3 }
 0xa73   :  { %4031 = vmatpush3.bf16.msk.msra.mxu1 %vm4324_vm9, %v4105_v14  ;;  %vm2328_vm9 = vcmp.lt.s32.totalorder %v4137_v3, 11  ;;  %v2595_v3 = vld [vmem:[%s4856_s2 + $0x78] sm:$0xff] }
 0xa74   :  { %3806 = vmatprep.subr.mxu1 %v4104_v4  ;;  %vm2329_vm15 = vmand %vm842_vm13, %vm2328_vm9  ;;  %v4051_v48 = vpack.c.bf16 %v2596_v41, %v2595_v3  ;;  %v2851_v41 = vld [vmem:[%s4856_s2 + $0x110] sm:$0xff] }
 0xa75   :  { %vm2332_vm14 = vmor %vm2329_vm15, %vm2331_vm7  ;;  %vm3218_vm15 = vcmask 1024  }
 0xa76   :  { %v3356_v35 = vsel %vm2332_vm14, 1.0, %v4104_v4  ;;  %vm4925_vm13 = vmmov %vm4924_vm3 }
 0xa77   :  { %3807 = vmatpush3.msk.msra.mxu1 %vm4921_vm1, %v4106_v20  ;;  %vm4928_vm1 = vmmov %vm4924_vm3 }
 0xa78   :  { %3809 = vmatmul.mubr.msk.f32.vlgmr.msra.gmra.mrb[30].mxu1 %vm4922_vm11, %v1593_v45  ;;  %4038 = vmatprep.subr.bf16.mxu1 %v4102_v1  ;;  %vm4929_vm11 = vmmov %vm4928_vm1 }
 0xa79   :  { %3839 = vmatprep.mubr.msk.f32.mxu1 %vm4895_vm0, %v4104_v4  ;;  %4040 = vmatpush3.bf16.msra.mxu1 %v4039_v10  ;;  %vm4931_vm9 = vmmov %vm4928_vm1 }
 0xa7a   :  { %4041 = vmatprep.subr.bf16.mxu1 %v4102_v1 }
 0xa7d   :  { %4043 = vmatpush3.bf16.msra.mxu1 %v4042_v23  ;;  %v2683_v23 = vld [vmem:[%s4856_s2 + $0xc0] sm:$0xff] }
 0xa7e   :  { %3837 = vmatprep.subr.mxu1 %v4104_v4 }
 0xa81   :  { %3838 = vmatpush3.msra.mxu1 %v2349_v25 }
 0xa82   :  { %4050 = vmatprep.subr.bf16.mxu1 %v4102_v1 }
 0xb41   :  { %v2170_v46 = vpop.f32.mrb[28].mxu1 }
 0xb42   :  { %v2174_v14 = vadd.f32 %v2170_v46, %v2029_v59  ;;  %v3797_v63 = vpop.f32.mrb[29].mxu1  ;;  %v2680_v59 = vld [vmem:[%s4856_s2 + $0xa8] sm:$0xff] }
 0xb43   :  { %v4063_v63 = vpack.c.bf16 %v2764_v38, %v2763_v60 }
 0xb4b   :  { %v2242_v20 = vpop.f32.mrb[30].mxu1 }
 0xb4c   :  { %v3810_v0 = vpop.f32.mrb[31].mxu1  ;;  %3812 = vmatpush3.msra.mxu0 %v2242_v20  ;;  %v2682_v20 = vld [vmem:[%s4856_s2 + $0xb8] sm:$0xff] }
 0xb4d   :  { %3814 = vmatmul.mubr.msk.f32.vlgmr.msra.gmra.mrb[26].mxu0 %vm4923_vm2, %v2175_v17  ;;  %4032 = vmatprep.subr.bf16.mxu0 %v4102_v1  ;;  %v2681_v17 = vld [vmem:[%s4856_s2 + $0xb0] sm:$0xff]  ;;  %v2765_v0 = vld [vmem:[%s4856_s2 + $0xd8] sm:$0xff]  ;;  %vm4930_vm2 = vmmov %vm4928_vm1 }
 0xb4e   :  { %3826 = vmatprep.mubr.msk.f32.mxu0 %vm4895_vm0, %v4104_v4  ;;  %4034 = vmatpush3.bf16.msra.mxu0 %v4033_v8  ;;  %v4060_v8 = vpack.c.bf16 %v2682_v20, %v2681_v17  ;;  %v4066_v9 = vpack.c.bf16 %v2766_v5, %v2765_v0 }
 0xb4f   :  { %4035 = vmatprep.subr.bf16.mxu0 %v4102_v1 }
 0xb52   :  { %4037 = vmatpush3.bf16.msra.mxu0 %v4036_v19  ;;  %v2848_v19 = vld [vmem:[%s4856_s2 + $0xf8] sm:$0xff] }
 0xb53   :  { %3824 = vmatprep.subr.mxu0 %v4104_v4  ;;  %v4069_v29 = vpack.c.bf16 %v2848_v19, %v2847_v12  ;;  %v3137_v12 = vld [vmem:[%s4856_s2 + $0x160] sm:$0xff]  ;;  %v3138_v19 = vld [vmem:[%s4856_s2 + $0x168] sm:$0xff] }
 0xb54   :  { %v4087_v21 = vpack.c.bf16 %v3138_v19, %v3137_v12 }
 0xb56   :  { %3825 = vmatpush3.msra.mxu0 %v2359_v24  ;;  %v2767_v24 = vld [vmem:[%s4856_s2 + $0xe8] sm:$0xff] }
 0xb57   :  { %4044 = vmatprep.subr.bf16.mxu0 %v4102_v1 }
 0xc20   :  { %v2315_v31 = vpop.f32.mrb[26].mxu0 }
 0xc21   :  { %v2319_v33 = vadd.f32 %v2315_v31, %v2174_v14  ;;  %v3815_v13 = vpop.f32.mrb[27].mxu0  ;;  %v4057_v14 = vpack.c.bf16 %v2680_v59, %v2679_v36  ;;  %v2849_v31 = vld [vmem:[%s4856_s2 + $0x100] sm:$0xff] }
 0xc22   :  { %v2934_v13 = vld [vmem:[%s4856_s2 + $0x130] sm:$0xff] }
 0xc23   :  { %v2326_v34 = vadd.f32 %v2324_v32, %v2319_v33  ;;  %v2850_v32 = vld [vmem:[%s4856_s2 + $0x108] sm:$0xff] }
 0xc24   :  { %v2933_v33 = vld [vmem:[%s4856_s2 + $0x128] sm:$0xff] }
 0xc25   :  { %v2327_v37 = vmax.f32 %v2326_v34, 0.0  ;;  %v2854_v34 = vsub.s32 6, %v4135_v2  ;;  %v4078_v16 = vpack.c.bf16 %v2934_v13, %v2933_v33 }
 0xc27   :  { %v4644_v18 = vmul.f32 %v3356_v35, %v2327_v37  ;;  %v2938_v35 = vsub.s32 7, %v4135_v2  ;;  %v4072_v37 = vpack.c.bf16 %v2850_v32, %v2849_v31 }
 0xc29   :  { %v2363_v43 = vrot.slane %v4644_v18, %v2362_v39  ;;  %v2353_v45 = vrot.slane %v4644_v18, %v2352_v15  ;;  %v2519_v57 = vrot.slane %v4644_v18, %v2518_v54  ;;  %v2603_v58 = vrot.slane %v4644_v18, %v2602_v55 }
 0xc2a   :  { %v2687_v10 = vrot.slane %v4644_v18, %v2686_v6  ;;  %v2771_v11 = vrot.slane %v4644_v18, %v2770_v7  ;;  %v2855_v40 = vrot.slane %v4644_v18, %v2854_v34  ;;  %v2939_v3 = vrot.slane %v4644_v18, %v2938_v35  ;;  %v3021_v18 = vld [vmem:[%s4856_s2 + $0x140] sm:$0xff] }
 0xc2b   :  { %v2364_v50 = vmul.f32 %v4656_v42, %v2363_v43  ;;  %v2354_v51 = vmul.f32 %v4656_v42, %v2353_v45  ;;  %v2520_v44 = vmul.f32 %v4656_v42, %v2519_v57  ;;  %v2604_v46 = vmul.f32 %v4656_v42, %v2603_v58  ;;  %v2935_v43 = vld [vmem:[%s4856_s2 + $0x138] sm:$0xff] }
 0xc2c   :  { %v2688_v25 = vmul.f32 %v4656_v42, %v2687_v10  ;;  %v2772_v27 = vmul.f32 %v4656_v42, %v2771_v11  ;;  %v2856_v45 = vmul.f32 %v4656_v42, %v2855_v40 }
 0xc2d   :  { %3827 = vmatmul.mubr.msk.f32.vlgmr.msra.gmra.mrb[28].mxu0 %vm4924_vm3, %v2364_v50  ;;  %3840 = vmatmul.mubr.msk.f32.vlgmr.msra.gmra.mrb[32].mxu1 %vm4925_vm13, %v2354_v51 }
 0xc2e   :  { %4046 = vmatpush3.bf16.msra.mxu0 %v4045_v47  ;;  %4052 = vmatpush3.bf16.msra.mxu1 %v4051_v48  ;;  %v2940_v47 = vmul.f32 %v4656_v42, %v2939_v3  ;;  %v3022_v42 = vld [vmem:[%s4856_s2 + $0x148] sm:$0xff] }
 0xc2f   :  { %4047 = vmatprep.subr.bf16.mxu0 %v4102_v1  ;;  %4053 = vmatprep.subr.bf16.mxu1 %v4102_v1  ;;  %v4081_v48 = vpack.c.bf16 %v3022_v42, %v3021_v18 }
 0xc30   :  { %3852 = vmatprep.mubr.msk.f32.mxu0 %vm4895_vm0, %v4104_v4  ;;  %3865 = vmatprep.mubr.msk.f32.mxu1 %vm4895_vm0, %v4104_v4 }
 0xc32   :  { %4049 = vmatpush3.bf16.msra.mxu0 %v4048_v56  ;;  %4055 = vmatpush3.bf16.msra.mxu1 %v4054_v28 }
 0xc33   :  { %3850 = vmatprep.subr.mxu0 %v4104_v4  ;;  %3863 = vmatprep.subr.mxu1 %v4104_v4 }
 0xc36   :  { %3851 = vmatpush3.msra.mxu0 %v2515_v61  ;;  %3864 = vmatpush3.msra.mxu1 %v2599_v62 }
 0xc37   :  { %3853 = vmatmul.mubr.msk.f32.vlgmr.msra.gmra.mrb[30].mxu0 %vm4926_vm10, %v2520_v44  ;;  %3866 = vmatmul.mubr.msk.f32.vlgmr.msra.gmra.mrb[34].mxu1 %vm4927_vm5, %v2604_v46 }
 0xc38   :  { %4056 = vmatprep.subr.bf16.mxu0 %v4102_v1  ;;  %4062 = vmatprep.subr.bf16.mxu1 %v4102_v1 }
 0xc39   :  { %4058 = vmatpush3.bf16.msra.mxu0 %v4057_v14  ;;  %4064 = vmatpush3.bf16.msra.mxu1 %v4063_v63  ;;  %v2336_v63 = vld [vmem:[%s4857_s3] sm:$0x1f] }
 0xc3a   :  { %4059 = vmatprep.subr.bf16.mxu0 %v4102_v1  ;;  %4065 = vmatprep.subr.bf16.mxu1 %v4102_v1  ;;  %v3018_v5 = vrot.slane %v2336_v63, %v2352_v15  ;;  %v3139_v15 = vld [vmem:[%s4856_s2 + $0x170] sm:$0xff] }
 0xc3b   :  { %3878 = vmatprep.mubr.msk.f32.mxu0 %vm4895_vm0, %v4104_v4  ;;  %3891 = vmatprep.mubr.msk.f32.mxu1 %vm4895_vm0, %v4104_v4 }
 0xc3d   :  { %4061 = vmatpush3.bf16.msra.mxu0 %v4060_v8  ;;  %4067 = vmatpush3.bf16.msra.mxu1 %v4066_v9 }
 0xc3e   :  { %3876 = vmatprep.subr.mxu0 %v4104_v4  ;;  %3889 = vmatprep.subr.mxu1 %v4104_v4 }
 0xc41   :  { %3877 = vmatpush3.msra.mxu0 %v2683_v23  ;;  %3890 = vmatpush3.msra.mxu1 %v2767_v24  ;;  %v4090_v23 = vpack.c.bf16 %v3140_v22, %v3139_v15  ;;  %v3028_v24 = vrot.slane %v2336_v63, %v2362_v39 }
 0xc42   :  { %3879 = vmatmul.mubr.msk.f32.vlgmr.msra.gmra.mrb[32].mxu0 %vm4928_vm1, %v2688_v25  ;;  %3892 = vmatmul.mubr.msk.f32.vlgmr.msra.gmra.mrb[36].mxu1 %vm4929_vm11, %v2772_v27 }
 0xc43   :  { %4068 = vmatprep.subr.bf16.mxu0 %v4102_v1  ;;  %4074 = vmatprep.subr.bf16.mxu1 %v4102_v1 }
 0xc44   :  { %4070 = vmatpush3.bf16.msra.mxu0 %v4069_v29  ;;  %4076 = vmatpush3.bf16.msra.mxu1 %v4075_v30 }
 0xc45   :  { %4071 = vmatprep.subr.bf16.mxu0 %v4102_v1  ;;  %4077 = vmatprep.subr.bf16.mxu1 %v4102_v1 }
 0xc46   :  { %3904 = vmatprep.mubr.msk.f32.mxu0 %vm4895_vm0, %v4104_v4  ;;  %3917 = vmatprep.mubr.msk.f32.mxu1 %vm4895_vm0, %v4104_v4 }
 0xc48   :  { %4073 = vmatpush3.bf16.msra.mxu0 %v4072_v37  ;;  %4079 = vmatpush3.bf16.msra.mxu1 %v4078_v16 }
 0xc49   :  { %3902 = vmatprep.subr.mxu0 %v4104_v4  ;;  %3915 = vmatprep.subr.mxu1 %v4104_v4 }
 0xc4c   :  { %3903 = vmatpush3.msra.mxu0 %v2851_v41  ;;  %3916 = vmatpush3.msra.mxu1 %v2935_v43 }
 0xc4d   :  { %3905 = vmatmul.mubr.msk.f32.vlgmr.msra.gmra.mrb[34].mxu0 %vm4930_vm2, %v2856_v45  ;;  %3918 = vmatmul.mubr.msk.f32.vlgmr.msra.gmra.mrb[38].mxu1 %vm4931_vm9, %v2940_v47 }
 0xc4e   :  { %4080 = vmatprep.subr.bf16.mxu0 %v4102_v1  ;;  %3928 = vmatprep.mubr.msk.f32.mxu0 %vm4895_vm0, %v4104_v4 }
 0xc4f   :  { %4086 = vmatprep.subr.bf16.mxu1 %v4102_v1  ;;  %3939 = vmatprep.mubr.msk.f32.mxu1 %vm4895_vm0, %v4104_v4  ;;  %v3024_v4 = vld [vmem:[%s4856_s2 + $0x158] sm:$0xff]  ;;  %vm3029_vm0 = vcmask 261120  }
 0xc50   :  { %4082 = vmatpush3.bf16.msra.mxu0 %v4081_v48  ;;  %v4084_v50 = vpack.c.bf16 %v3024_v4, %v3023_v49  ;;  %4088 = vmatpush3.bf16.msra.mxu1 %v4087_v21  ;;  %v3129_v48 = vrot.slane %v2336_v63, %v2518_v54 }
 0xc51   :  { %4083 = vmatprep.subr.bf16.mxu0 %v4102_v1  ;;  %4089 = vmatprep.subr.bf16.mxu1 %v4102_v1 }
 0xc54   :  { %4085 = vmatpush3.bf16.msra.mxu0 %v4084_v50  ;;  %4091 = vmatpush3.bf16.msra.mxu1 %v4090_v23  ;;  %v3134_v50 = vrot.slane %v2336_v63, %v2602_v55 }
 0xd00   :  { %v2434_v51 = vpop.f32.mrb[28].mxu0  ;;  %v2507_v52 = vpop.f32.mrb[32].mxu1 }
 0xd01   :  { %v2508_v26 = vadd.f32 %v2507_v52, %v2434_v51  ;;  %v3828_v53 = vpop.f32.mrb[29].mxu0  ;;  %v3841_v56 = vpop.f32.mrb[33].mxu1 }
 0xd02   :  { %v3144_v53 = vrot.slane %v2336_v63, %v2686_v6 }
 0xd0a   :  { %v2590_v28 = vpop.f32.mrb[30].mxu0  ;;  %v2674_v57 = vpop.f32.mrb[34].mxu1 }
 0xd0b   :  { %v2594_v58 = vadd.f32 %v2590_v28, %v2508_v26  ;;  %v3854_v36 = vpop.f32.mrb[31].mxu0  ;;  %v3867_v59 = vpop.f32.mrb[35].mxu1 }
 0xd0d   :  { %v2678_v60 = vadd.f32 %v2674_v57, %v2594_v58 }
 0xd15   :  { %v2758_v38 = vpop.f32.mrb[32].mxu0  ;;  %v2842_v61 = vpop.f32.mrb[36].mxu1 }
 0xd16   :  { %v2762_v62 = vadd.f32 %v2758_v38, %v2678_v60  ;;  %v3880_v44 = vpop.f32.mrb[33].mxu0  ;;  %v3893_v46 = vpop.f32.mrb[37].mxu1 }
 0xd18   :  { %v2846_v14 = vadd.f32 %v2842_v61, %v2762_v62 }
 0xd20   :  { %v2926_v17 = vpop.f32.mrb[34].mxu0  ;;  %v3010_v20 = vpop.f32.mrb[38].mxu1 }
 0xd21   :  { %v2930_v0 = vadd.f32 %v2926_v17, %v2846_v14  ;;  %v3906_v7 = vpop.f32.mrb[35].mxu0  ;;  %v3919_v8 = vpop.f32.mrb[39].mxu1 }
 0xd23   :  { %v3014_v9 = vadd.f32 %v3010_v20, %v2930_v0 }
 0xd25   :  { %v3019_v10 = vadd.f32 %v3018_v5, %v3014_v9 }
 0xd27   :  { %v3020_v11 = vmax.f32 %v3019_v10, 0.0 }
 0xd29   :  { %3929 = vmatmul.mubr.msk.f32.vlgmr.msra.gmra.mrb[36].mxu0 %vm3029_vm0, %v3020_v11 }
 0xdfc   :  { %v3099_v25 = vpop.f32.mrb[36].mxu0 }
 0xdfd   :  { %v3100_v27 = vadd.f32 %v3099_v25, %v3028_v24  ;;  %v3930_v29 = vpop.f32.mrb[37].mxu0 }
 0xdff   :  { %v3104_v30 = vsel %vm3103_vm12, %v3100_v27, 0.0 }
 0xe00   :  { %v3105_v31 = vrot.slane %v3104_v30, 4 }
 0xe02   :  { %v3106_v1 = vadd.f32 %v3105_v31, %v3104_v30 }
 0xe04   :  { %v3107_v32 = vrot.slane %v3106_v1, 2 }
 0xe06   :  { %v3108_v33 = vadd.f32 %v3107_v32, %v3106_v1 }
 0xe08   :  { %v3109_v13 = vrot.slane %v3108_v33, 1 }
 0xe0a   :  { %v3110_v34 = vadd.f32 %v3109_v13, %v3108_v33 }
 0xe0c   :  { %v3112_v35 = vmul.f32 0.5, %v3110_v34 }
 0xe0e   :  { %v3113_v37 = vsub.f32 %v3100_v27, %v3112_v35 }
 0xe10   :  { %v3114_v16 = vmul.f32 %v3113_v37, %v3113_v37 }
 0xe12   :  { %v3115_v40 = vsel %vm3103_vm12, %v3114_v16, 0.0 }
 0xe13   :  { %v3116_v3 = vrot.slane %v3115_v40, 4 }
 0xe15   :  { %v3117_v41 = vadd.f32 %v3116_v3, %v3115_v40 }
 0xe17   :  { %v3118_v43 = vrot.slane %v3117_v41, 2 }
 0xe19   :  { %v3119_v45 = vadd.f32 %v3118_v43, %v3117_v41 }
 0xe1b   :  { %v3120_v39 = vrot.slane %v3119_v45, 1 }
 0xe1d   :  { %v3121_v47 = vadd.f32 %v3120_v39, %v3119_v45 }
 0xe1f   :  { %v3122_v18 = vmul.f32 0.5, %v3121_v47 }
 0xe21   :  { %v3123_v42 = vadd.f32 1e-05, %v3122_v18 }
 0xe23   :  { %4100 = vrsqrt.f32 %v3123_v42 }
 0xe2d   :  { %v4101_v49 = vpop.eup %4100 }
 0xe2e   :  { %v3125_v4 = vmul.f32 %v4101_v49, %v3113_v37 }
 0xe30   :  { %v3130_v51 = vmul.f32 %v3129_v48, %v3125_v4 }
 0xe32   :  { %v3135_v52 = vadd.f32 %v3134_v50, %v3130_v51 }
 0xe34   :  { %v3136_v26 = vmax.f32 %v3135_v52, 0.0 }
 0xe36   :  { %3940 = vmatmul.mubr.msk.f32.vlgmr.msra.gmra.mrb[40].mxu1 %vm3029_vm0, %v3136_v26 }
 0xf09   :  { %v3214_v56 = vpop.f32.mrb[40].mxu1 }
 0xf0a   :  { %v3215_v28 = vadd.f32 %v3214_v56, %v3144_v53  ;;  %v3941_v57 = vpop.f32.mrb[41].mxu1 }
 0xf0c   :  { %3219 = vst.msk [vmem:[%s4858_s4] sm:$0x3] %vm3218_vm15, %v3215_v28 }

</bundles_post_ra>
